<compile_context>
chip_gen: v5e
topology: v5e:2x2
jax: 0.10.0
libtpu: 0.0.40
codegen_flags: <defaults>
</compile_context>

<pallas_src>
import functools

import jax
import jax.numpy as jnp
from jax import lax
from jax.experimental import pallas as pl
from jax.experimental.pallas import tpu as pltpu

INPUT_DIM = 6
IN_PAD = 8           # feature dim zero-padded to a full sublane multiple
D_MODEL = 32
NLAYERS = 2
LN_EPS = 1e-5


def _sigmoid(v):
    # Exact logistic via the EUP tanh: sigmoid(x) = 0.5 * (1 + tanh(x/2)).
    # Keeps the transcendental on the otherwise-idle EUP slot instead of a
    # VPU reciprocal/divide sequence on the per-step critical path.
    return 0.5 * (jnp.tanh(0.5 * v) + 1.0)


def gru_kernel(x_ref, wih0_ref, whh0_ref, b0_ref,
               wih1_ref, whh1_ref, b1_ref, ln_ref, o_ref, *, Bp, S):
    """Wavefront 2-layer GRU + final LayerNorm.

    x_ref rows are time-major: rows [t*Bp, (t+1)*Bp) == x[:, t, :] (zero-padded
    batch/features).  Weights are packed (in, 3H) with gate order r|z|n along
    the lane axis, so each step is one h @ W_hh matmul + lane slices.
    """
    H = D_MODEL
    x = x_ref[...]                                     # (S*Bp, IN_PAD)

    # Hoist every weight/bias load out of the unrolled time loop (vreg-resident).
    wih0 = wih0_ref[...]                               # (IN_PAD, 3H)
    whh0 = whh0_ref[...]                               # (H, 3H)
    wih1 = wih1_ref[...]                               # (H, 3H)
    whh1 = whh1_ref[...]                               # (H, 3H)
    bi0 = b0_ref[0:1, :]                               # (1, 3H)  r|z|n input bias (r/z fused with b_hh)
    bh0 = b0_ref[1:2, :]                               # (1, 3H)  [0 | 0 | b_hn]
    bi1 = b1_ref[0:1, :]
    bh1 = b1_ref[1:2, :]

    # Layer-0 input projections for ALL timesteps in one bulk matmul.
    gi0_all = jnp.dot(x, wih0, preferred_element_type=jnp.float32) + bi0  # (S*Bp, 3H)

    def gru_step(gi, h, whh, bh):
        # One packed recurrent matmul per step; r/z/n are 32-lane static slices.
        gh = jnp.dot(h, whh, preferred_element_type=jnp.float32) + bh     # (Bp, 3H)
        r = _sigmoid(gi[:, 0:H] + gh[:, 0:H])
        z = _sigmoid(gi[:, H:2 * H] + gh[:, H:2 * H])
        n = jnp.tanh(gi[:, 2 * H:3 * H] + r * gh[:, 2 * H:3 * H])
        return (1.0 - z) * n + z * h

    # TODO(synk): on v6e/v7x the packed W_hh/h operands could be cast to bf16
    # (preferred_element_type=f32) to cut MXU passes; kept f32 to hold the
    # 5e-3 tolerance vs. the HIGHEST-precision reference. Keep f32 on v5e.
    h0 = jnp.zeros((Bp, H), jnp.float32)
    h1 = jnp.zeros((Bp, H), jnp.float32)
    for t in range(S):                                 # static, unrolled wavefront
        gi0 = gi0_all[t * Bp:(t + 1) * Bp, :]          # sublane-aligned (Bp == 8)
        h0 = gru_step(gi0, h0, whh0, bh0)              # layer-0 step t
        # TODO(synk): inter-layer dropout(p=0.1) is identity (eval semantics).
        gi1 = jnp.dot(h0, wih1, preferred_element_type=jnp.float32) + bi1
        h1 = gru_step(gi1, h1, whh1, bh1)              # layer-1 step t (overlaps h0 chain)

    # Final LayerNorm on the last top-layer hidden state (stable (x-mu)^2 form).
    mu = jnp.mean(h1, axis=-1, keepdims=True)
    xc = h1 - mu
    var = jnp.mean(xc * xc, axis=-1, keepdims=True)
    inv = lax.rsqrt(var + LN_EPS)
    o_ref[...] = (xc * inv * ln_ref[0:1, :] + ln_ref[1:2, :]).astype(o_ref.dtype)


def init_params(key):
    """Parameters in PyTorch nn.GRU / nn.LayerNorm layout (gate order r, z, n)."""
    ks = jax.random.split(key, 8)

    def w(k, shape, scale):
        return (scale * jax.random.normal(k, shape)).astype(jnp.float32)

    H = D_MODEL
    return dict(
        w_ih_l0=w(ks[0], (3 * H, INPUT_DIM), 0.2),
        w_hh_l0=w(ks[1], (3 * H, H), 0.2),
        b_ih_l0=w(ks[2], (3 * H,), 0.1),
        b_hh_l0=w(ks[3], (3 * H,), 0.1),
        w_ih_l1=w(ks[4], (3 * H, H), 0.2),
        w_hh_l1=w(ks[5], (3 * H, H), 0.2),
        b_ih_l1=w(ks[6], (3 * H,), 0.1),
        b_hh_l1=w(ks[7], (3 * H,), 0.1),
        ln_w=jnp.ones((H,), jnp.float32),
        ln_b=jnp.zeros((H,), jnp.float32),
    )


def prepare_kernel_args(params):
    """Host-side one-time repack: per layer one (in,3H) W_ih (gate order r|z|n
    along lanes), one (H,3H) W_hh, one (2,3H) bias block [bi_fused ; bh_n_only];
    plus one (2,H) LayerNorm block.  8 arrays total instead of 23."""
    H = D_MODEL
    args = []
    for l in range(NLAYERS):
        w_ih = params[f'w_ih_l{l}']          # (3H, in)
        w_hh = params[f'w_hh_l{l}']          # (3H, H)
        b_ih = params[f'b_ih_l{l}']          # (3H,)
        b_hh = params[f'b_hh_l{l}']          # (3H,)
        wih_p = w_ih.T                       # (in, 3H), columns ordered r|z|n
        if wih_p.shape[0] < IN_PAD:          # pad layer-0 feature dim 6 -> 8
            wih_p = jnp.pad(wih_p, ((0, IN_PAD - wih_p.shape[0]), (0, 0)))
        whh_p = w_hh.T                       # (H, 3H)
        bi = jnp.concatenate([b_ih[0:H] + b_hh[0:H],          # r (fused)
                              b_ih[H:2 * H] + b_hh[H:2 * H],  # z (fused)
                              b_ih[2 * H:3 * H]])             # n (input part only)
        bh = jnp.concatenate([jnp.zeros((2 * H,), jnp.float32),
                              b_hh[2 * H:3 * H]])             # n hidden bias only
        b_pack = jnp.stack([bi, bh], axis=0).astype(jnp.float32)   # (2, 3H)
        args += [wih_p.astype(jnp.float32), whh_p.astype(jnp.float32), b_pack]
    ln = jnp.stack([params['ln_w'], params['ln_b']], axis=0)       # (2, H)
    args.append(ln.astype(jnp.float32))
    return args


@jax.jit
def forward(x, *kernel_args):
    B, S, F = x.shape
    Bp = max(8, ((B + 7) // 8) * 8)          # pad batch to full sublanes
    xp = jnp.pad(x, ((0, Bp - B), (0, 0), (0, IN_PAD - F)))
    # Time-major rows; each timestep occupies a whole 8-sublane block.
    x2 = jnp.transpose(xp, (1, 0, 2)).reshape(S * Bp, IN_PAD).astype(jnp.float32)
    args = (x2,) + tuple(kernel_args)
    kern = functools.partial(gru_kernel, Bp=Bp, S=S)
    # Single grid point: whole problem is a few vregs; no scratch needed.
    # TODO(synk): for large batches add a leading batch grid axis with
    # dimension_semantics=("parallel",) to use both v7x TensorCores.
    out = pl.pallas_call(
        kern,
        out_shape=jax.ShapeDtypeStruct((Bp, D_MODEL), jnp.float32),
        in_specs=[pl.BlockSpec(memory_space=pltpu.MemorySpace.VMEM)] * len(args),
        out_specs=pl.BlockSpec(memory_space=pltpu.MemorySpace.VMEM),
    )(*args)
    return out[:B]


def gru_reference(x, params):
    """Plain-JAX reference of the PyTorch GRUEncoder forward (eval mode)."""
    B, S, _ = x.shape
    H = D_MODEL
    hi = jax.lax.Precision.HIGHEST
    layer_in = x
    for l in range(NLAYERS):
        w_ih = params[f'w_ih_l{l}']
        w_hh = params[f'w_hh_l{l}']
        b_ih = params[f'b_ih_l{l}']
        b_hh = params[f'b_hh_l{l}']
        h = jnp.zeros((B, H), jnp.float32)
        outs = []
        for t in range(S):
            xt = layer_in[:, t, :]
            gi = jnp.dot(xt, w_ih.T, precision=hi) + b_ih
            gh = jnp.dot(h, w_hh.T, precision=hi) + b_hh
            r = jax.nn.sigmoid(gi[:, :H] + gh[:, :H])
            z = jax.nn.sigmoid(gi[:, H:2 * H] + gh[:, H:2 * H])
            n = jnp.tanh(gi[:, 2 * H:] + r * gh[:, 2 * H:])
            h = (1.0 - z) * n + z * h
            outs.append(h)
        layer_in = jnp.stack(outs, axis=1)
    last = layer_in[:, -1, :]
    mu = last.mean(-1, keepdims=True)
    var = ((last - mu) ** 2).mean(-1, keepdims=True)
    return (last - mu) / jnp.sqrt(var + LN_EPS) * params['ln_w'] + params['ln_b']


if __name__ == "__main__":
    key = jax.random.PRNGKey(0)
    pkey, xkey = jax.random.split(key)
    params = init_params(pkey)
    kargs = prepare_kernel_args(params)

    B, S = 2, 8
    x = jax.random.normal(xkey, (B, S, INPUT_DIM), dtype=jnp.float32)

    out = forward(x, *kargs)
    jax.block_until_ready(out)
    assert out.shape == (B, D_MODEL), out.shape
    assert bool(jnp.all(jnp.isfinite(out)))

    ref = gru_reference(x, params)
    assert bool(jnp.allclose(out, ref, rtol=5e-3, atol=5e-3)), (
        float(jnp.max(jnp.abs(out - ref))))
    print("KERNEL_OK")
</pallas_src>

<mosaic_0001>
module attributes {stable_mosaic.version = 11 : i64} {
  func.func @gru_kernel(%arg0: memref<64x8xf32, #tpu.memory_space<vmem>>, %arg1: memref<8x96xf32, #tpu.memory_space<vmem>>, %arg2: memref<32x96xf32, #tpu.memory_space<vmem>>, %arg3: memref<2x96xf32, #tpu.memory_space<vmem>>, %arg4: memref<32x96xf32, #tpu.memory_space<vmem>>, %arg5: memref<32x96xf32, #tpu.memory_space<vmem>>, %arg6: memref<2x96xf32, #tpu.memory_space<vmem>>, %arg7: memref<2x32xf32, #tpu.memory_space<vmem>>, %arg8: memref<8x32xf32, #tpu.memory_space<vmem>>) attributes {dimension_semantics = [], scalar_prefetch = 0 : i64, scratch_operands = 0 : i64, tpu.core_type = #tpu.core_type<tc>} {
    %c0 = arith.constant 0 : index
    %c0_0 = arith.constant 0 : index
    %0 = vector.load %arg0[%c0, %c0_0] : memref<64x8xf32, #tpu.memory_space<vmem>>, vector<64x8xf32>
    %c0_1 = arith.constant 0 : index
    %c0_2 = arith.constant 0 : index
    %1 = vector.load %arg1[%c0_1, %c0_2] : memref<8x96xf32, #tpu.memory_space<vmem>>, vector<8x96xf32>
    %c0_3 = arith.constant 0 : index
    %c0_4 = arith.constant 0 : index
    %2 = vector.load %arg2[%c0_3, %c0_4] : memref<32x96xf32, #tpu.memory_space<vmem>>, vector<32x96xf32>
    %c0_5 = arith.constant 0 : index
    %c0_6 = arith.constant 0 : index
    %3 = vector.load %arg4[%c0_5, %c0_6] : memref<32x96xf32, #tpu.memory_space<vmem>>, vector<32x96xf32>
    %c0_7 = arith.constant 0 : index
    %c0_8 = arith.constant 0 : index
    %4 = vector.load %arg5[%c0_7, %c0_8] : memref<32x96xf32, #tpu.memory_space<vmem>>, vector<32x96xf32>
    %c0_9 = arith.constant 0 : index
    %c0_10 = arith.constant 0 : index
    %5 = vector.load %arg3[%c0_9, %c0_10] : memref<2x96xf32, #tpu.memory_space<vmem>>, vector<1x96xf32>
    %c1 = arith.constant 1 : index
    %c0_11 = arith.constant 0 : index
    %6 = vector.load %arg3[%c1, %c0_11] : memref<2x96xf32, #tpu.memory_space<vmem>>, vector<1x96xf32>
    %c0_12 = arith.constant 0 : index
    %c0_13 = arith.constant 0 : index
    %7 = vector.load %arg6[%c0_12, %c0_13] : memref<2x96xf32, #tpu.memory_space<vmem>>, vector<1x96xf32>
    %c1_14 = arith.constant 1 : index
    %c0_15 = arith.constant 0 : index
    %8 = vector.load %arg6[%c1_14, %c0_15] : memref<2x96xf32, #tpu.memory_space<vmem>>, vector<1x96xf32>
    %cst = arith.constant dense<0.000000e+00> : vector<64x96xf32>
    %9 = tpu.matmul %0, %1, %cst {dimension_numbers = #tpu.dot_dimension_numbers<[1], [0], [0], [1], [0, 0, 1, 1], [], []>} : vector<64x8xf32>, vector<8x96xf32>, vector<64x96xf32> -> vector<64x96xf32>
    %10 = vector.broadcast %5 : vector<1x96xf32> to vector<64x96xf32>
    %11 = arith.addf %9, %10 : vector<64x96xf32>
    %cst_16 = arith.constant 0.000000e+00 : f32
    %12 = vector.broadcast %cst_16 : f32 to vector<8x32xf32>
    %cst_17 = arith.constant 0.000000e+00 : f32
    %13 = vector.broadcast %cst_17 : f32 to vector<8x32xf32>
    %14 = vector.extract_strided_slice %11 {offsets = [0, 0], sizes = [8, 96], strides = [1, 1]} : vector<64x96xf32> to vector<8x96xf32>
    %cst_18 = arith.constant dense<0.000000e+00> : vector<8x96xf32>
    %15 = tpu.matmul %12, %2, %cst_18 {dimension_numbers = #tpu.dot_dimension_numbers<[1], [0], [0], [1], [0, 0, 1, 1], [], []>} : vector<8x32xf32>, vector<32x96xf32>, vector<8x96xf32> -> vector<8x96xf32>
    %16 = vector.broadcast %6 : vector<1x96xf32> to vector<8x96xf32>
    %17 = arith.addf %15, %16 : vector<8x96xf32>
    %18 = vector.extract_strided_slice %14 {offsets = [0, 0], sizes = [8, 32], strides = [1, 1]} : vector<8x96xf32> to vector<8x32xf32>
    %19 = vector.extract_strided_slice %17 {offsets = [0, 0], sizes = [8, 32], strides = [1, 1]} : vector<8x96xf32> to vector<8x32xf32>
    %20 = arith.addf %18, %19 : vector<8x32xf32>
    %cst_19 = arith.constant 5.000000e-01 : f32
    %21 = vector.broadcast %cst_19 : f32 to vector<8x32xf32>
    %22 = arith.mulf %21, %20 : vector<8x32xf32>
    %23 = math.tanh %22 : vector<8x32xf32>
    %cst_20 = arith.constant 1.000000e+00 : f32
    %24 = vector.broadcast %cst_20 : f32 to vector<8x32xf32>
    %25 = arith.addf %23, %24 : vector<8x32xf32>
    %cst_21 = arith.constant 5.000000e-01 : f32
    %26 = vector.broadcast %cst_21 : f32 to vector<8x32xf32>
    %27 = arith.mulf %26, %25 : vector<8x32xf32>
    %28 = vector.extract_strided_slice %14 {offsets = [0, 32], sizes = [8, 32], strides = [1, 1]} : vector<8x96xf32> to vector<8x32xf32>
    %29 = vector.extract_strided_slice %17 {offsets = [0, 32], sizes = [8, 32], strides = [1, 1]} : vector<8x96xf32> to vector<8x32xf32>
    %30 = arith.addf %28, %29 : vector<8x32xf32>
    %cst_22 = arith.constant 5.000000e-01 : f32
    %31 = vector.broadcast %cst_22 : f32 to vector<8x32xf32>
    %32 = arith.mulf %31, %30 : vector<8x32xf32>
    %33 = math.tanh %32 : vector<8x32xf32>
    %cst_23 = arith.constant 1.000000e+00 : f32
    %34 = vector.broadcast %cst_23 : f32 to vector<8x32xf32>
    %35 = arith.addf %33, %34 : vector<8x32xf32>
    %cst_24 = arith.constant 5.000000e-01 : f32
    %36 = vector.broadcast %cst_24 : f32 to vector<8x32xf32>
    %37 = arith.mulf %36, %35 : vector<8x32xf32>
    %38 = vector.extract_strided_slice %14 {offsets = [0, 64], sizes = [8, 32], strides = [1, 1]} : vector<8x96xf32> to vector<8x32xf32>
    %39 = vector.extract_strided_slice %17 {offsets = [0, 64], sizes = [8, 32], strides = [1, 1]} : vector<8x96xf32> to vector<8x32xf32>
    %40 = arith.mulf %27, %39 : vector<8x32xf32>
    %41 = arith.addf %38, %40 : vector<8x32xf32>
    %42 = math.tanh %41 : vector<8x32xf32>
    %cst_25 = arith.constant 1.000000e+00 : f32
    %43 = vector.broadcast %cst_25 : f32 to vector<8x32xf32>
    %44 = arith.subf %43, %37 : vector<8x32xf32>
    %45 = arith.mulf %44, %42 : vector<8x32xf32>
    %46 = arith.mulf %37, %12 : vector<8x32xf32>
    %47 = arith.addf %45, %46 : vector<8x32xf32>
    %cst_26 = arith.constant dense<0.000000e+00> : vector<8x96xf32>
    %48 = tpu.matmul %47, %3, %cst_26 {dimension_numbers = #tpu.dot_dimension_numbers<[1], [0], [0], [1], [0, 0, 1, 1], [], []>} : vector<8x32xf32>, vector<32x96xf32>, vector<8x96xf32> -> vector<8x96xf32>
    %49 = vector.broadcast %7 : vector<1x96xf32> to vector<8x96xf32>
    %50 = arith.addf %48, %49 : vector<8x96xf32>
    %cst_27 = arith.constant dense<0.000000e+00> : vector<8x96xf32>
    %51 = tpu.matmul %13, %4, %cst_27 {dimension_numbers = #tpu.dot_dimension_numbers<[1], [0], [0], [1], [0, 0, 1, 1], [], []>} : vector<8x32xf32>, vector<32x96xf32>, vector<8x96xf32> -> vector<8x96xf32>
    %52 = vector.broadcast %8 : vector<1x96xf32> to vector<8x96xf32>
    %53 = arith.addf %51, %52 : vector<8x96xf32>
    %54 = vector.extract_strided_slice %50 {offsets = [0, 0], sizes = [8, 32], strides = [1, 1]} : vector<8x96xf32> to vector<8x32xf32>
    %55 = vector.extract_strided_slice %53 {offsets = [0, 0], sizes = [8, 32], strides = [1, 1]} : vector<8x96xf32> to vector<8x32xf32>
    %56 = arith.addf %54, %55 : vector<8x32xf32>
    %cst_28 = arith.constant 5.000000e-01 : f32
    %57 = vector.broadcast %cst_28 : f32 to vector<8x32xf32>
    %58 = arith.mulf %57, %56 : vector<8x32xf32>
    %59 = math.tanh %58 : vector<8x32xf32>
    %cst_29 = arith.constant 1.000000e+00 : f32
    %60 = vector.broadcast %cst_29 : f32 to vector<8x32xf32>
    %61 = arith.addf %59, %60 : vector<8x32xf32>
    %cst_30 = arith.constant 5.000000e-01 : f32
    %62 = vector.broadcast %cst_30 : f32 to vector<8x32xf32>
    %63 = arith.mulf %62, %61 : vector<8x32xf32>
    %64 = vector.extract_strided_slice %50 {offsets = [0, 32], sizes = [8, 32], strides = [1, 1]} : vector<8x96xf32> to vector<8x32xf32>
    %65 = vector.extract_strided_slice %53 {offsets = [0, 32], sizes = [8, 32], strides = [1, 1]} : vector<8x96xf32> to vector<8x32xf32>
    %66 = arith.addf %64, %65 : vector<8x32xf32>
    %cst_31 = arith.constant 5.000000e-01 : f32
    %67 = vector.broadcast %cst_31 : f32 to vector<8x32xf32>
    %68 = arith.mulf %67, %66 : vector<8x32xf32>
    %69 = math.tanh %68 : vector<8x32xf32>
    %cst_32 = arith.constant 1.000000e+00 : f32
    %70 = vector.broadcast %cst_32 : f32 to vector<8x32xf32>
    %71 = arith.addf %69, %70 : vector<8x32xf32>
    %cst_33 = arith.constant 5.000000e-01 : f32
    %72 = vector.broadcast %cst_33 : f32 to vector<8x32xf32>
    %73 = arith.mulf %72, %71 : vector<8x32xf32>
    %74 = vector.extract_strided_slice %50 {offsets = [0, 64], sizes = [8, 32], strides = [1, 1]} : vector<8x96xf32> to vector<8x32xf32>
    %75 = vector.extract_strided_slice %53 {offsets = [0, 64], sizes = [8, 32], strides = [1, 1]} : vector<8x96xf32> to vector<8x32xf32>
    %76 = arith.mulf %63, %75 : vector<8x32xf32>
    %77 = arith.addf %74, %76 : vector<8x32xf32>
    %78 = math.tanh %77 : vector<8x32xf32>
    %cst_34 = arith.constant 1.000000e+00 : f32
    %79 = vector.broadcast %cst_34 : f32 to vector<8x32xf32>
    %80 = arith.subf %79, %73 : vector<8x32xf32>
    %81 = arith.mulf %80, %78 : vector<8x32xf32>
    %82 = arith.mulf %73, %13 : vector<8x32xf32>
    %83 = arith.addf %81, %82 : vector<8x32xf32>
    %84 = vector.extract_strided_slice %11 {offsets = [8, 0], sizes = [8, 96], strides = [1, 1]} : vector<64x96xf32> to vector<8x96xf32>
    %cst_35 = arith.constant dense<0.000000e+00> : vector<8x96xf32>
    %85 = tpu.matmul %47, %2, %cst_35 {dimension_numbers = #tpu.dot_dimension_numbers<[1], [0], [0], [1], [0, 0, 1, 1], [], []>} : vector<8x32xf32>, vector<32x96xf32>, vector<8x96xf32> -> vector<8x96xf32>
    %86 = vector.broadcast %6 : vector<1x96xf32> to vector<8x96xf32>
    %87 = arith.addf %85, %86 : vector<8x96xf32>
    %88 = vector.extract_strided_slice %84 {offsets = [0, 0], sizes = [8, 32], strides = [1, 1]} : vector<8x96xf32> to vector<8x32xf32>
    %89 = vector.extract_strided_slice %87 {offsets = [0, 0], sizes = [8, 32], strides = [1, 1]} : vector<8x96xf32> to vector<8x32xf32>
    %90 = arith.addf %88, %89 : vector<8x32xf32>
    %cst_36 = arith.constant 5.000000e-01 : f32
    %91 = vector.broadcast %cst_36 : f32 to vector<8x32xf32>
    %92 = arith.mulf %91, %90 : vector<8x32xf32>
    %93 = math.tanh %92 : vector<8x32xf32>
    %cst_37 = arith.constant 1.000000e+00 : f32
    %94 = vector.broadcast %cst_37 : f32 to vector<8x32xf32>
    %95 = arith.addf %93, %94 : vector<8x32xf32>
    %cst_38 = arith.constant 5.000000e-01 : f32
    %96 = vector.broadcast %cst_38 : f32 to vector<8x32xf32>
    %97 = arith.mulf %96, %95 : vector<8x32xf32>
    %98 = vector.extract_strided_slice %84 {offsets = [0, 32], sizes = [8, 32], strides = [1, 1]} : vector<8x96xf32> to vector<8x32xf32>
    %99 = vector.extract_strided_slice %87 {offsets = [0, 32], sizes = [8, 32], strides = [1, 1]} : vector<8x96xf32> to vector<8x32xf32>
    %100 = arith.addf %98, %99 : vector<8x32xf32>
    %cst_39 = arith.constant 5.000000e-01 : f32
    %101 = vector.broadcast %cst_39 : f32 to vector<8x32xf32>
    %102 = arith.mulf %101, %100 : vector<8x32xf32>
    %103 = math.tanh %102 : vector<8x32xf32>
    %cst_40 = arith.constant 1.000000e+00 : f32
    %104 = vector.broadcast %cst_40 : f32 to vector<8x32xf32>
    %105 = arith.addf %103, %104 : vector<8x32xf32>
    %cst_41 = arith.constant 5.000000e-01 : f32
    %106 = vector.broadcast %cst_41 : f32 to vector<8x32xf32>
    %107 = arith.mulf %106, %105 : vector<8x32xf32>
    %108 = vector.extract_strided_slice %84 {offsets = [0, 64], sizes = [8, 32], strides = [1, 1]} : vector<8x96xf32> to vector<8x32xf32>
    %109 = vector.extract_strided_slice %87 {offsets = [0, 64], sizes = [8, 32], strides = [1, 1]} : vector<8x96xf32> to vector<8x32xf32>
    %110 = arith.mulf %97, %109 : vector<8x32xf32>
    %111 = arith.addf %108, %110 : vector<8x32xf32>
    %112 = math.tanh %111 : vector<8x32xf32>
    %cst_42 = arith.constant 1.000000e+00 : f32
    %113 = vector.broadcast %cst_42 : f32 to vector<8x32xf32>
    %114 = arith.subf %113, %107 : vector<8x32xf32>
    %115 = arith.mulf %114, %112 : vector<8x32xf32>
    %116 = arith.mulf %107, %47 : vector<8x32xf32>
    %117 = arith.addf %115, %116 : vector<8x32xf32>
    %cst_43 = arith.constant dense<0.000000e+00> : vector<8x96xf32>
    %118 = tpu.matmul %117, %3, %cst_43 {dimension_numbers = #tpu.dot_dimension_numbers<[1], [0], [0], [1], [0, 0, 1, 1], [], []>} : vector<8x32xf32>, vector<32x96xf32>, vector<8x96xf32> -> vector<8x96xf32>
    %119 = vector.broadcast %7 : vector<1x96xf32> to vector<8x96xf32>
    %120 = arith.addf %118, %119 : vector<8x96xf32>
    %cst_44 = arith.constant dense<0.000000e+00> : vector<8x96xf32>
    %121 = tpu.matmul %83, %4, %cst_44 {dimension_numbers = #tpu.dot_dimension_numbers<[1], [0], [0], [1], [0, 0, 1, 1], [], []>} : vector<8x32xf32>, vector<32x96xf32>, vector<8x96xf32> -> vector<8x96xf32>
    %122 = vector.broadcast %8 : vector<1x96xf32> to vector<8x96xf32>
    %123 = arith.addf %121, %122 : vector<8x96xf32>
    %124 = vector.extract_strided_slice %120 {offsets = [0, 0], sizes = [8, 32], strides = [1, 1]} : vector<8x96xf32> to vector<8x32xf32>
    %125 = vector.extract_strided_slice %123 {offsets = [0, 0], sizes = [8, 32], strides = [1, 1]} : vector<8x96xf32> to vector<8x32xf32>
    %126 = arith.addf %124, %125 : vector<8x32xf32>
    %cst_45 = arith.constant 5.000000e-01 : f32
    %127 = vector.broadcast %cst_45 : f32 to vector<8x32xf32>
    %128 = arith.mulf %127, %126 : vector<8x32xf32>
    %129 = math.tanh %128 : vector<8x32xf32>
    %cst_46 = arith.constant 1.000000e+00 : f32
    %130 = vector.broadcast %cst_46 : f32 to vector<8x32xf32>
    %131 = arith.addf %129, %130 : vector<8x32xf32>
    %cst_47 = arith.constant 5.000000e-01 : f32
    %132 = vector.broadcast %cst_47 : f32 to vector<8x32xf32>
    %133 = arith.mulf %132, %131 : vector<8x32xf32>
    %134 = vector.extract_strided_slice %120 {offsets = [0, 32], sizes = [8, 32], strides = [1, 1]} : vector<8x96xf32> to vector<8x32xf32>
    %135 = vector.extract_strided_slice %123 {offsets = [0, 32], sizes = [8, 32], strides = [1, 1]} : vector<8x96xf32> to vector<8x32xf32>
    %136 = arith.addf %134, %135 : vector<8x32xf32>
    %cst_48 = arith.constant 5.000000e-01 : f32
    %137 = vector.broadcast %cst_48 : f32 to vector<8x32xf32>
    %138 = arith.mulf %137, %136 : vector<8x32xf32>
    %139 = math.tanh %138 : vector<8x32xf32>
    %cst_49 = arith.constant 1.000000e+00 : f32
    %140 = vector.broadcast %cst_49 : f32 to vector<8x32xf32>
    %141 = arith.addf %139, %140 : vector<8x32xf32>
    %cst_50 = arith.constant 5.000000e-01 : f32
    %142 = vector.broadcast %cst_50 : f32 to vector<8x32xf32>
    %143 = arith.mulf %142, %141 : vector<8x32xf32>
    %144 = vector.extract_strided_slice %120 {offsets = [0, 64], sizes = [8, 32], strides = [1, 1]} : vector<8x96xf32> to vector<8x32xf32>
    %145 = vector.extract_strided_slice %123 {offsets = [0, 64], sizes = [8, 32], strides = [1, 1]} : vector<8x96xf32> to vector<8x32xf32>
    %146 = arith.mulf %133, %145 : vector<8x32xf32>
    %147 = arith.addf %144, %146 : vector<8x32xf32>
    %148 = math.tanh %147 : vector<8x32xf32>
    %cst_51 = arith.constant 1.000000e+00 : f32
    %149 = vector.broadcast %cst_51 : f32 to vector<8x32xf32>
    %150 = arith.subf %149, %143 : vector<8x32xf32>
    %151 = arith.mulf %150, %148 : vector<8x32xf32>
    %152 = arith.mulf %143, %83 : vector<8x32xf32>
    %153 = arith.addf %151, %152 : vector<8x32xf32>
    %154 = vector.extract_strided_slice %11 {offsets = [16, 0], sizes = [8, 96], strides = [1, 1]} : vector<64x96xf32> to vector<8x96xf32>
    %cst_52 = arith.constant dense<0.000000e+00> : vector<8x96xf32>
    %155 = tpu.matmul %117, %2, %cst_52 {dimension_numbers = #tpu.dot_dimension_numbers<[1], [0], [0], [1], [0, 0, 1, 1], [], []>} : vector<8x32xf32>, vector<32x96xf32>, vector<8x96xf32> -> vector<8x96xf32>
    %156 = vector.broadcast %6 : vector<1x96xf32> to vector<8x96xf32>
    %157 = arith.addf %155, %156 : vector<8x96xf32>
    %158 = vector.extract_strided_slice %154 {offsets = [0, 0], sizes = [8, 32], strides = [1, 1]} : vector<8x96xf32> to vector<8x32xf32>
    %159 = vector.extract_strided_slice %157 {offsets = [0, 0], sizes = [8, 32], strides = [1, 1]} : vector<8x96xf32> to vector<8x32xf32>
    %160 = arith.addf %158, %159 : vector<8x32xf32>
    %cst_53 = arith.constant 5.000000e-01 : f32
    %161 = vector.broadcast %cst_53 : f32 to vector<8x32xf32>
    %162 = arith.mulf %161, %160 : vector<8x32xf32>
    %163 = math.tanh %162 : vector<8x32xf32>
    %cst_54 = arith.constant 1.000000e+00 : f32
    %164 = vector.broadcast %cst_54 : f32 to vector<8x32xf32>
    %165 = arith.addf %163, %164 : vector<8x32xf32>
    %cst_55 = arith.constant 5.000000e-01 : f32
    %166 = vector.broadcast %cst_55 : f32 to vector<8x32xf32>
    %167 = arith.mulf %166, %165 : vector<8x32xf32>
    %168 = vector.extract_strided_slice %154 {offsets = [0, 32], sizes = [8, 32], strides = [1, 1]} : vector<8x96xf32> to vector<8x32xf32>
    %169 = vector.extract_strided_slice %157 {offsets = [0, 32], sizes = [8, 32], strides = [1, 1]} : vector<8x96xf32> to vector<8x32xf32>
    %170 = arith.addf %168, %169 : vector<8x32xf32>
    %cst_56 = arith.constant 5.000000e-01 : f32
    %171 = vector.broadcast %cst_56 : f32 to vector<8x32xf32>
    %172 = arith.mulf %171, %170 : vector<8x32xf32>
    %173 = math.tanh %172 : vector<8x32xf32>
    %cst_57 = arith.constant 1.000000e+00 : f32
    %174 = vector.broadcast %cst_57 : f32 to vector<8x32xf32>
    %175 = arith.addf %173, %174 : vector<8x32xf32>
    %cst_58 = arith.constant 5.000000e-01 : f32
    %176 = vector.broadcast %cst_58 : f32 to vector<8x32xf32>
    %177 = arith.mulf %176, %175 : vector<8x32xf32>
    %178 = vector.extract_strided_slice %154 {offsets = [0, 64], sizes = [8, 32], strides = [1, 1]} : vector<8x96xf32> to vector<8x32xf32>
    %179 = vector.extract_strided_slice %157 {offsets = [0, 64], sizes = [8, 32], strides = [1, 1]} : vector<8x96xf32> to vector<8x32xf32>
    %180 = arith.mulf %167, %179 : vector<8x32xf32>
    %181 = arith.addf %178, %180 : vector<8x32xf32>
    %182 = math.tanh %181 : vector<8x32xf32>
    %cst_59 = arith.constant 1.000000e+00 : f32
    %183 = vector.broadcast %cst_59 : f32 to vector<8x32xf32>
    %184 = arith.subf %183, %177 : vector<8x32xf32>
    %185 = arith.mulf %184, %182 : vector<8x32xf32>
    %186 = arith.mulf %177, %117 : vector<8x32xf32>
    %187 = arith.addf %185, %186 : vector<8x32xf32>
    %cst_60 = arith.constant dense<0.000000e+00> : vector<8x96xf32>
    %188 = tpu.matmul %187, %3, %cst_60 {dimension_numbers = #tpu.dot_dimension_numbers<[1], [0], [0], [1], [0, 0, 1, 1], [], []>} : vector<8x32xf32>, vector<32x96xf32>, vector<8x96xf32> -> vector<8x96xf32>
    %189 = vector.broadcast %7 : vector<1x96xf32> to vector<8x96xf32>
    %190 = arith.addf %188, %189 : vector<8x96xf32>
    %cst_61 = arith.constant dense<0.000000e+00> : vector<8x96xf32>
    %191 = tpu.matmul %153, %4, %cst_61 {dimension_numbers = #tpu.dot_dimension_numbers<[1], [0], [0], [1], [0, 0, 1, 1], [], []>} : vector<8x32xf32>, vector<32x96xf32>, vector<8x96xf32> -> vector<8x96xf32>
    %192 = vector.broadcast %8 : vector<1x96xf32> to vector<8x96xf32>
    %193 = arith.addf %191, %192 : vector<8x96xf32>
    %194 = vector.extract_strided_slice %190 {offsets = [0, 0], sizes = [8, 32], strides = [1, 1]} : vector<8x96xf32> to vector<8x32xf32>
    %195 = vector.extract_strided_slice %193 {offsets = [0, 0], sizes = [8, 32], strides = [1, 1]} : vector<8x96xf32> to vector<8x32xf32>
    %196 = arith.addf %194, %195 : vector<8x32xf32>
    %cst_62 = arith.constant 5.000000e-01 : f32
    %197 = vector.broadcast %cst_62 : f32 to vector<8x32xf32>
    %198 = arith.mulf %197, %196 : vector<8x32xf32>
    %199 = math.tanh %198 : vector<8x32xf32>
    %cst_63 = arith.constant 1.000000e+00 : f32
    %200 = vector.broadcast %cst_63 : f32 to vector<8x32xf32>
    %201 = arith.addf %199, %200 : vector<8x32xf32>
    %cst_64 = arith.constant 5.000000e-01 : f32
    %202 = vector.broadcast %cst_64 : f32 to vector<8x32xf32>
    %203 = arith.mulf %202, %201 : vector<8x32xf32>
    %204 = vector.extract_strided_slice %190 {offsets = [0, 32], sizes = [8, 32], strides = [1, 1]} : vector<8x96xf32> to vector<8x32xf32>
    %205 = vector.extract_strided_slice %193 {offsets = [0, 32], sizes = [8, 32], strides = [1, 1]} : vector<8x96xf32> to vector<8x32xf32>
    %206 = arith.addf %204, %205 : vector<8x32xf32>
    %cst_65 = arith.constant 5.000000e-01 : f32
    %207 = vector.broadcast %cst_65 : f32 to vector<8x32xf32>
    %208 = arith.mulf %207, %206 : vector<8x32xf32>
    %209 = math.tanh %208 : vector<8x32xf32>
    %cst_66 = arith.constant 1.000000e+00 : f32
    %210 = vector.broadcast %cst_66 : f32 to vector<8x32xf32>
    %211 = arith.addf %209, %210 : vector<8x32xf32>
    %cst_67 = arith.constant 5.000000e-01 : f32
    %212 = vector.broadcast %cst_67 : f32 to vector<8x32xf32>
    %213 = arith.mulf %212, %211 : vector<8x32xf32>
    %214 = vector.extract_strided_slice %190 {offsets = [0, 64], sizes = [8, 32], strides = [1, 1]} : vector<8x96xf32> to vector<8x32xf32>
    %215 = vector.extract_strided_slice %193 {offsets = [0, 64], sizes = [8, 32], strides = [1, 1]} : vector<8x96xf32> to vector<8x32xf32>
    %216 = arith.mulf %203, %215 : vector<8x32xf32>
    %217 = arith.addf %214, %216 : vector<8x32xf32>
    %218 = math.tanh %217 : vector<8x32xf32>
    %cst_68 = arith.constant 1.000000e+00 : f32
    %219 = vector.broadcast %cst_68 : f32 to vector<8x32xf32>
    %220 = arith.subf %219, %213 : vector<8x32xf32>
    %221 = arith.mulf %220, %218 : vector<8x32xf32>
    %222 = arith.mulf %213, %153 : vector<8x32xf32>
    %223 = arith.addf %221, %222 : vector<8x32xf32>
    %224 = vector.extract_strided_slice %11 {offsets = [24, 0], sizes = [8, 96], strides = [1, 1]} : vector<64x96xf32> to vector<8x96xf32>
    %cst_69 = arith.constant dense<0.000000e+00> : vector<8x96xf32>
    %225 = tpu.matmul %187, %2, %cst_69 {dimension_numbers = #tpu.dot_dimension_numbers<[1], [0], [0], [1], [0, 0, 1, 1], [], []>} : vector<8x32xf32>, vector<32x96xf32>, vector<8x96xf32> -> vector<8x96xf32>
    %226 = vector.broadcast %6 : vector<1x96xf32> to vector<8x96xf32>
    %227 = arith.addf %225, %226 : vector<8x96xf32>
    %228 = vector.extract_strided_slice %224 {offsets = [0, 0], sizes = [8, 32], strides = [1, 1]} : vector<8x96xf32> to vector<8x32xf32>
    %229 = vector.extract_strided_slice %227 {offsets = [0, 0], sizes = [8, 32], strides = [1, 1]} : vector<8x96xf32> to vector<8x32xf32>
    %230 = arith.addf %228, %229 : vector<8x32xf32>
    %cst_70 = arith.constant 5.000000e-01 : f32
    %231 = vector.broadcast %cst_70 : f32 to vector<8x32xf32>
    %232 = arith.mulf %231, %230 : vector<8x32xf32>
    %233 = math.tanh %232 : vector<8x32xf32>
    %cst_71 = arith.constant 1.000000e+00 : f32
    %234 = vector.broadcast %cst_71 : f32 to vector<8x32xf32>
    %235 = arith.addf %233, %234 : vector<8x32xf32>
    %cst_72 = arith.constant 5.000000e-01 : f32
    %236 = vector.broadcast %cst_72 : f32 to vector<8x32xf32>
    %237 = arith.mulf %236, %235 : vector<8x32xf32>
    %238 = vector.extract_strided_slice %224 {offsets = [0, 32], sizes = [8, 32], strides = [1, 1]} : vector<8x96xf32> to vector<8x32xf32>
    %239 = vector.extract_strided_slice %227 {offsets = [0, 32], sizes = [8, 32], strides = [1, 1]} : vector<8x96xf32> to vector<8x32xf32>
    %240 = arith.addf %238, %239 : vector<8x32xf32>
    %cst_73 = arith.constant 5.000000e-01 : f32
    %241 = vector.broadcast %cst_73 : f32 to vector<8x32xf32>
    %242 = arith.mulf %241, %240 : vector<8x32xf32>
    %243 = math.tanh %242 : vector<8x32xf32>
    %cst_74 = arith.constant 1.000000e+00 : f32
    %244 = vector.broadcast %cst_74 : f32 to vector<8x32xf32>
    %245 = arith.addf %243, %244 : vector<8x32xf32>
    %cst_75 = arith.constant 5.000000e-01 : f32
    %246 = vector.broadcast %cst_75 : f32 to vector<8x32xf32>
    %247 = arith.mulf %246, %245 : vector<8x32xf32>
    %248 = vector.extract_strided_slice %224 {offsets = [0, 64], sizes = [8, 32], strides = [1, 1]} : vector<8x96xf32> to vector<8x32xf32>
    %249 = vector.extract_strided_slice %227 {offsets = [0, 64], sizes = [8, 32], strides = [1, 1]} : vector<8x96xf32> to vector<8x32xf32>
    %250 = arith.mulf %237, %249 : vector<8x32xf32>
    %251 = arith.addf %248, %250 : vector<8x32xf32>
    %252 = math.tanh %251 : vector<8x32xf32>
    %cst_76 = arith.constant 1.000000e+00 : f32
    %253 = vector.broadcast %cst_76 : f32 to vector<8x32xf32>
    %254 = arith.subf %253, %247 : vector<8x32xf32>
    %255 = arith.mulf %254, %252 : vector<8x32xf32>
    %256 = arith.mulf %247, %187 : vector<8x32xf32>
    %257 = arith.addf %255, %256 : vector<8x32xf32>
    %cst_77 = arith.constant dense<0.000000e+00> : vector<8x96xf32>
    %258 = tpu.matmul %257, %3, %cst_77 {dimension_numbers = #tpu.dot_dimension_numbers<[1], [0], [0], [1], [0, 0, 1, 1], [], []>} : vector<8x32xf32>, vector<32x96xf32>, vector<8x96xf32> -> vector<8x96xf32>
    %259 = vector.broadcast %7 : vector<1x96xf32> to vector<8x96xf32>
    %260 = arith.addf %258, %259 : vector<8x96xf32>
    %cst_78 = arith.constant dense<0.000000e+00> : vector<8x96xf32>
    %261 = tpu.matmul %223, %4, %cst_78 {dimension_numbers = #tpu.dot_dimension_numbers<[1], [0], [0], [1], [0, 0, 1, 1], [], []>} : vector<8x32xf32>, vector<32x96xf32>, vector<8x96xf32> -> vector<8x96xf32>
    %262 = vector.broadcast %8 : vector<1x96xf32> to vector<8x96xf32>
    %263 = arith.addf %261, %262 : vector<8x96xf32>
    %264 = vector.extract_strided_slice %260 {offsets = [0, 0], sizes = [8, 32], strides = [1, 1]} : vector<8x96xf32> to vector<8x32xf32>
    %265 = vector.extract_strided_slice %263 {offsets = [0, 0], sizes = [8, 32], strides = [1, 1]} : vector<8x96xf32> to vector<8x32xf32>
    %266 = arith.addf %264, %265 : vector<8x32xf32>
    %cst_79 = arith.constant 5.000000e-01 : f32
    %267 = vector.broadcast %cst_79 : f32 to vector<8x32xf32>
    %268 = arith.mulf %267, %266 : vector<8x32xf32>
    %269 = math.tanh %268 : vector<8x32xf32>
    %cst_80 = arith.constant 1.000000e+00 : f32
    %270 = vector.broadcast %cst_80 : f32 to vector<8x32xf32>
    %271 = arith.addf %269, %270 : vector<8x32xf32>
    %cst_81 = arith.constant 5.000000e-01 : f32
    %272 = vector.broadcast %cst_81 : f32 to vector<8x32xf32>
    %273 = arith.mulf %272, %271 : vector<8x32xf32>
    %274 = vector.extract_strided_slice %260 {offsets = [0, 32], sizes = [8, 32], strides = [1, 1]} : vector<8x96xf32> to vector<8x32xf32>
    %275 = vector.extract_strided_slice %263 {offsets = [0, 32], sizes = [8, 32], strides = [1, 1]} : vector<8x96xf32> to vector<8x32xf32>
    %276 = arith.addf %274, %275 : vector<8x32xf32>
    %cst_82 = arith.constant 5.000000e-01 : f32
    %277 = vector.broadcast %cst_82 : f32 to vector<8x32xf32>
    %278 = arith.mulf %277, %276 : vector<8x32xf32>
    %279 = math.tanh %278 : vector<8x32xf32>
    %cst_83 = arith.constant 1.000000e+00 : f32
    %280 = vector.broadcast %cst_83 : f32 to vector<8x32xf32>
    %281 = arith.addf %279, %280 : vector<8x32xf32>
    %cst_84 = arith.constant 5.000000e-01 : f32
    %282 = vector.broadcast %cst_84 : f32 to vector<8x32xf32>
    %283 = arith.mulf %282, %281 : vector<8x32xf32>
    %284 = vector.extract_strided_slice %260 {offsets = [0, 64], sizes = [8, 32], strides = [1, 1]} : vector<8x96xf32> to vector<8x32xf32>
    %285 = vector.extract_strided_slice %263 {offsets = [0, 64], sizes = [8, 32], strides = [1, 1]} : vector<8x96xf32> to vector<8x32xf32>
    %286 = arith.mulf %273, %285 : vector<8x32xf32>
    %287 = arith.addf %284, %286 : vector<8x32xf32>
    %288 = math.tanh %287 : vector<8x32xf32>
    %cst_85 = arith.constant 1.000000e+00 : f32
    %289 = vector.broadcast %cst_85 : f32 to vector<8x32xf32>
    %290 = arith.subf %289, %283 : vector<8x32xf32>
    %291 = arith.mulf %290, %288 : vector<8x32xf32>
    %292 = arith.mulf %283, %223 : vector<8x32xf32>
    %293 = arith.addf %291, %292 : vector<8x32xf32>
    %294 = vector.extract_strided_slice %11 {offsets = [32, 0], sizes = [8, 96], strides = [1, 1]} : vector<64x96xf32> to vector<8x96xf32>
    %cst_86 = arith.constant dense<0.000000e+00> : vector<8x96xf32>
    %295 = tpu.matmul %257, %2, %cst_86 {dimension_numbers = #tpu.dot_dimension_numbers<[1], [0], [0], [1], [0, 0, 1, 1], [], []>} : vector<8x32xf32>, vector<32x96xf32>, vector<8x96xf32> -> vector<8x96xf32>
    %296 = vector.broadcast %6 : vector<1x96xf32> to vector<8x96xf32>
    %297 = arith.addf %295, %296 : vector<8x96xf32>
    %298 = vector.extract_strided_slice %294 {offsets = [0, 0], sizes = [8, 32], strides = [1, 1]} : vector<8x96xf32> to vector<8x32xf32>
    %299 = vector.extract_strided_slice %297 {offsets = [0, 0], sizes = [8, 32], strides = [1, 1]} : vector<8x96xf32> to vector<8x32xf32>
    %300 = arith.addf %298, %299 : vector<8x32xf32>
    %cst_87 = arith.constant 5.000000e-01 : f32
    %301 = vector.broadcast %cst_87 : f32 to vector<8x32xf32>
    %302 = arith.mulf %301, %300 : vector<8x32xf32>
    %303 = math.tanh %302 : vector<8x32xf32>
    %cst_88 = arith.constant 1.000000e+00 : f32
    %304 = vector.broadcast %cst_88 : f32 to vector<8x32xf32>
    %305 = arith.addf %303, %304 : vector<8x32xf32>
    %cst_89 = arith.constant 5.000000e-01 : f32
    %306 = vector.broadcast %cst_89 : f32 to vector<8x32xf32>
    %307 = arith.mulf %306, %305 : vector<8x32xf32>
    %308 = vector.extract_strided_slice %294 {offsets = [0, 32], sizes = [8, 32], strides = [1, 1]} : vector<8x96xf32> to vector<8x32xf32>
    %309 = vector.extract_strided_slice %297 {offsets = [0, 32], sizes = [8, 32], strides = [1, 1]} : vector<8x96xf32> to vector<8x32xf32>
    %310 = arith.addf %308, %309 : vector<8x32xf32>
    %cst_90 = arith.constant 5.000000e-01 : f32
    %311 = vector.broadcast %cst_90 : f32 to vector<8x32xf32>
    %312 = arith.mulf %311, %310 : vector<8x32xf32>
    %313 = math.tanh %312 : vector<8x32xf32>
    %cst_91 = arith.constant 1.000000e+00 : f32
    %314 = vector.broadcast %cst_91 : f32 to vector<8x32xf32>
    %315 = arith.addf %313, %314 : vector<8x32xf32>
    %cst_92 = arith.constant 5.000000e-01 : f32
    %316 = vector.broadcast %cst_92 : f32 to vector<8x32xf32>
    %317 = arith.mulf %316, %315 : vector<8x32xf32>
    %318 = vector.extract_strided_slice %294 {offsets = [0, 64], sizes = [8, 32], strides = [1, 1]} : vector<8x96xf32> to vector<8x32xf32>
    %319 = vector.extract_strided_slice %297 {offsets = [0, 64], sizes = [8, 32], strides = [1, 1]} : vector<8x96xf32> to vector<8x32xf32>
    %320 = arith.mulf %307, %319 : vector<8x32xf32>
    %321 = arith.addf %318, %320 : vector<8x32xf32>
    %322 = math.tanh %321 : vector<8x32xf32>
    %cst_93 = arith.constant 1.000000e+00 : f32
    %323 = vector.broadcast %cst_93 : f32 to vector<8x32xf32>
    %324 = arith.subf %323, %317 : vector<8x32xf32>
    %325 = arith.mulf %324, %322 : vector<8x32xf32>
    %326 = arith.mulf %317, %257 : vector<8x32xf32>
    %327 = arith.addf %325, %326 : vector<8x32xf32>
    %cst_94 = arith.constant dense<0.000000e+00> : vector<8x96xf32>
    %328 = tpu.matmul %327, %3, %cst_94 {dimension_numbers = #tpu.dot_dimension_numbers<[1], [0], [0], [1], [0, 0, 1, 1], [], []>} : vector<8x32xf32>, vector<32x96xf32>, vector<8x96xf32> -> vector<8x96xf32>
    %329 = vector.broadcast %7 : vector<1x96xf32> to vector<8x96xf32>
    %330 = arith.addf %328, %329 : vector<8x96xf32>
    %cst_95 = arith.constant dense<0.000000e+00> : vector<8x96xf32>
    %331 = tpu.matmul %293, %4, %cst_95 {dimension_numbers = #tpu.dot_dimension_numbers<[1], [0], [0], [1], [0, 0, 1, 1], [], []>} : vector<8x32xf32>, vector<32x96xf32>, vector<8x96xf32> -> vector<8x96xf32>
    %332 = vector.broadcast %8 : vector<1x96xf32> to vector<8x96xf32>
    %333 = arith.addf %331, %332 : vector<8x96xf32>
    %334 = vector.extract_strided_slice %330 {offsets = [0, 0], sizes = [8, 32], strides = [1, 1]} : vector<8x96xf32> to vector<8x32xf32>
    %335 = vector.extract_strided_slice %333 {offsets = [0, 0], sizes = [8, 32], strides = [1, 1]} : vector<8x96xf32> to vector<8x32xf32>
    %336 = arith.addf %334, %335 : vector<8x32xf32>
    %cst_96 = arith.constant 5.000000e-01 : f32
    %337 = vector.broadcast %cst_96 : f32 to vector<8x32xf32>
    %338 = arith.mulf %337, %336 : vector<8x32xf32>
    %339 = math.tanh %338 : vector<8x32xf32>
    %cst_97 = arith.constant 1.000000e+00 : f32
    %340 = vector.broadcast %cst_97 : f32 to vector<8x32xf32>
    %341 = arith.addf %339, %340 : vector<8x32xf32>
    %cst_98 = arith.constant 5.000000e-01 : f32
    %342 = vector.broadcast %cst_98 : f32 to vector<8x32xf32>
    %343 = arith.mulf %342, %341 : vector<8x32xf32>
    %344 = vector.extract_strided_slice %330 {offsets = [0, 32], sizes = [8, 32], strides = [1, 1]} : vector<8x96xf32> to vector<8x32xf32>
    %345 = vector.extract_strided_slice %333 {offsets = [0, 32], sizes = [8, 32], strides = [1, 1]} : vector<8x96xf32> to vector<8x32xf32>
    %346 = arith.addf %344, %345 : vector<8x32xf32>
    %cst_99 = arith.constant 5.000000e-01 : f32
    %347 = vector.broadcast %cst_99 : f32 to vector<8x32xf32>
    %348 = arith.mulf %347, %346 : vector<8x32xf32>
    %349 = math.tanh %348 : vector<8x32xf32>
    %cst_100 = arith.constant 1.000000e+00 : f32
    %350 = vector.broadcast %cst_100 : f32 to vector<8x32xf32>
    %351 = arith.addf %349, %350 : vector<8x32xf32>
    %cst_101 = arith.constant 5.000000e-01 : f32
    %352 = vector.broadcast %cst_101 : f32 to vector<8x32xf32>
    %353 = arith.mulf %352, %351 : vector<8x32xf32>
    %354 = vector.extract_strided_slice %330 {offsets = [0, 64], sizes = [8, 32], strides = [1, 1]} : vector<8x96xf32> to vector<8x32xf32>
    %355 = vector.extract_strided_slice %333 {offsets = [0, 64], sizes = [8, 32], strides = [1, 1]} : vector<8x96xf32> to vector<8x32xf32>
    %356 = arith.mulf %343, %355 : vector<8x32xf32>
    %357 = arith.addf %354, %356 : vector<8x32xf32>
    %358 = math.tanh %357 : vector<8x32xf32>
    %cst_102 = arith.constant 1.000000e+00 : f32
    %359 = vector.broadcast %cst_102 : f32 to vector<8x32xf32>
    %360 = arith.subf %359, %353 : vector<8x32xf32>
    %361 = arith.mulf %360, %358 : vector<8x32xf32>
    %362 = arith.mulf %353, %293 : vector<8x32xf32>
    %363 = arith.addf %361, %362 : vector<8x32xf32>
    %364 = vector.extract_strided_slice %11 {offsets = [40, 0], sizes = [8, 96], strides = [1, 1]} : vector<64x96xf32> to vector<8x96xf32>
    %cst_103 = arith.constant dense<0.000000e+00> : vector<8x96xf32>
    %365 = tpu.matmul %327, %2, %cst_103 {dimension_numbers = #tpu.dot_dimension_numbers<[1], [0], [0], [1], [0, 0, 1, 1], [], []>} : vector<8x32xf32>, vector<32x96xf32>, vector<8x96xf32> -> vector<8x96xf32>
    %366 = vector.broadcast %6 : vector<1x96xf32> to vector<8x96xf32>
    %367 = arith.addf %365, %366 : vector<8x96xf32>
    %368 = vector.extract_strided_slice %364 {offsets = [0, 0], sizes = [8, 32], strides = [1, 1]} : vector<8x96xf32> to vector<8x32xf32>
    %369 = vector.extract_strided_slice %367 {offsets = [0, 0], sizes = [8, 32], strides = [1, 1]} : vector<8x96xf32> to vector<8x32xf32>
    %370 = arith.addf %368, %369 : vector<8x32xf32>
    %cst_104 = arith.constant 5.000000e-01 : f32
    %371 = vector.broadcast %cst_104 : f32 to vector<8x32xf32>
    %372 = arith.mulf %371, %370 : vector<8x32xf32>
    %373 = math.tanh %372 : vector<8x32xf32>
    %cst_105 = arith.constant 1.000000e+00 : f32
    %374 = vector.broadcast %cst_105 : f32 to vector<8x32xf32>
    %375 = arith.addf %373, %374 : vector<8x32xf32>
    %cst_106 = arith.constant 5.000000e-01 : f32
    %376 = vector.broadcast %cst_106 : f32 to vector<8x32xf32>
    %377 = arith.mulf %376, %375 : vector<8x32xf32>
    %378 = vector.extract_strided_slice %364 {offsets = [0, 32], sizes = [8, 32], strides = [1, 1]} : vector<8x96xf32> to vector<8x32xf32>
    %379 = vector.extract_strided_slice %367 {offsets = [0, 32], sizes = [8, 32], strides = [1, 1]} : vector<8x96xf32> to vector<8x32xf32>
    %380 = arith.addf %378, %379 : vector<8x32xf32>
    %cst_107 = arith.constant 5.000000e-01 : f32
    %381 = vector.broadcast %cst_107 : f32 to vector<8x32xf32>
    %382 = arith.mulf %381, %380 : vector<8x32xf32>
    %383 = math.tanh %382 : vector<8x32xf32>
    %cst_108 = arith.constant 1.000000e+00 : f32
    %384 = vector.broadcast %cst_108 : f32 to vector<8x32xf32>
    %385 = arith.addf %383, %384 : vector<8x32xf32>
    %cst_109 = arith.constant 5.000000e-01 : f32
    %386 = vector.broadcast %cst_109 : f32 to vector<8x32xf32>
    %387 = arith.mulf %386, %385 : vector<8x32xf32>
    %388 = vector.extract_strided_slice %364 {offsets = [0, 64], sizes = [8, 32], strides = [1, 1]} : vector<8x96xf32> to vector<8x32xf32>
    %389 = vector.extract_strided_slice %367 {offsets = [0, 64], sizes = [8, 32], strides = [1, 1]} : vector<8x96xf32> to vector<8x32xf32>
    %390 = arith.mulf %377, %389 : vector<8x32xf32>
    %391 = arith.addf %388, %390 : vector<8x32xf32>
    %392 = math.tanh %391 : vector<8x32xf32>
    %cst_110 = arith.constant 1.000000e+00 : f32
    %393 = vector.broadcast %cst_110 : f32 to vector<8x32xf32>
    %394 = arith.subf %393, %387 : vector<8x32xf32>
    %395 = arith.mulf %394, %392 : vector<8x32xf32>
    %396 = arith.mulf %387, %327 : vector<8x32xf32>
    %397 = arith.addf %395, %396 : vector<8x32xf32>
    %cst_111 = arith.constant dense<0.000000e+00> : vector<8x96xf32>
    %398 = tpu.matmul %397, %3, %cst_111 {dimension_numbers = #tpu.dot_dimension_numbers<[1], [0], [0], [1], [0, 0, 1, 1], [], []>} : vector<8x32xf32>, vector<32x96xf32>, vector<8x96xf32> -> vector<8x96xf32>
    %399 = vector.broadcast %7 : vector<1x96xf32> to vector<8x96xf32>
    %400 = arith.addf %398, %399 : vector<8x96xf32>
    %cst_112 = arith.constant dense<0.000000e+00> : vector<8x96xf32>
    %401 = tpu.matmul %363, %4, %cst_112 {dimension_numbers = #tpu.dot_dimension_numbers<[1], [0], [0], [1], [0, 0, 1, 1], [], []>} : vector<8x32xf32>, vector<32x96xf32>, vector<8x96xf32> -> vector<8x96xf32>
    %402 = vector.broadcast %8 : vector<1x96xf32> to vector<8x96xf32>
    %403 = arith.addf %401, %402 : vector<8x96xf32>
    %404 = vector.extract_strided_slice %400 {offsets = [0, 0], sizes = [8, 32], strides = [1, 1]} : vector<8x96xf32> to vector<8x32xf32>
    %405 = vector.extract_strided_slice %403 {offsets = [0, 0], sizes = [8, 32], strides = [1, 1]} : vector<8x96xf32> to vector<8x32xf32>
    %406 = arith.addf %404, %405 : vector<8x32xf32>
    %cst_113 = arith.constant 5.000000e-01 : f32
    %407 = vector.broadcast %cst_113 : f32 to vector<8x32xf32>
    %408 = arith.mulf %407, %406 : vector<8x32xf32>
    %409 = math.tanh %408 : vector<8x32xf32>
    %cst_114 = arith.constant 1.000000e+00 : f32
    %410 = vector.broadcast %cst_114 : f32 to vector<8x32xf32>
    %411 = arith.addf %409, %410 : vector<8x32xf32>
    %cst_115 = arith.constant 5.000000e-01 : f32
    %412 = vector.broadcast %cst_115 : f32 to vector<8x32xf32>
    %413 = arith.mulf %412, %411 : vector<8x32xf32>
    %414 = vector.extract_strided_slice %400 {offsets = [0, 32], sizes = [8, 32], strides = [1, 1]} : vector<8x96xf32> to vector<8x32xf32>
    %415 = vector.extract_strided_slice %403 {offsets = [0, 32], sizes = [8, 32], strides = [1, 1]} : vector<8x96xf32> to vector<8x32xf32>
    %416 = arith.addf %414, %415 : vector<8x32xf32>
    %cst_116 = arith.constant 5.000000e-01 : f32
    %417 = vector.broadcast %cst_116 : f32 to vector<8x32xf32>
    %418 = arith.mulf %417, %416 : vector<8x32xf32>
    %419 = math.tanh %418 : vector<8x32xf32>
    %cst_117 = arith.constant 1.000000e+00 : f32
    %420 = vector.broadcast %cst_117 : f32 to vector<8x32xf32>
    %421 = arith.addf %419, %420 : vector<8x32xf32>
    %cst_118 = arith.constant 5.000000e-01 : f32
    %422 = vector.broadcast %cst_118 : f32 to vector<8x32xf32>
    %423 = arith.mulf %422, %421 : vector<8x32xf32>
    %424 = vector.extract_strided_slice %400 {offsets = [0, 64], sizes = [8, 32], strides = [1, 1]} : vector<8x96xf32> to vector<8x32xf32>
    %425 = vector.extract_strided_slice %403 {offsets = [0, 64], sizes = [8, 32], strides = [1, 1]} : vector<8x96xf32> to vector<8x32xf32>
    %426 = arith.mulf %413, %425 : vector<8x32xf32>
    %427 = arith.addf %424, %426 : vector<8x32xf32>
    %428 = math.tanh %427 : vector<8x32xf32>
    %cst_119 = arith.constant 1.000000e+00 : f32
    %429 = vector.broadcast %cst_119 : f32 to vector<8x32xf32>
    %430 = arith.subf %429, %423 : vector<8x32xf32>
    %431 = arith.mulf %430, %428 : vector<8x32xf32>
    %432 = arith.mulf %423, %363 : vector<8x32xf32>
    %433 = arith.addf %431, %432 : vector<8x32xf32>
    %434 = vector.extract_strided_slice %11 {offsets = [48, 0], sizes = [8, 96], strides = [1, 1]} : vector<64x96xf32> to vector<8x96xf32>
    %cst_120 = arith.constant dense<0.000000e+00> : vector<8x96xf32>
    %435 = tpu.matmul %397, %2, %cst_120 {dimension_numbers = #tpu.dot_dimension_numbers<[1], [0], [0], [1], [0, 0, 1, 1], [], []>} : vector<8x32xf32>, vector<32x96xf32>, vector<8x96xf32> -> vector<8x96xf32>
    %436 = vector.broadcast %6 : vector<1x96xf32> to vector<8x96xf32>
    %437 = arith.addf %435, %436 : vector<8x96xf32>
    %438 = vector.extract_strided_slice %434 {offsets = [0, 0], sizes = [8, 32], strides = [1, 1]} : vector<8x96xf32> to vector<8x32xf32>
    %439 = vector.extract_strided_slice %437 {offsets = [0, 0], sizes = [8, 32], strides = [1, 1]} : vector<8x96xf32> to vector<8x32xf32>
    %440 = arith.addf %438, %439 : vector<8x32xf32>
    %cst_121 = arith.constant 5.000000e-01 : f32
    %441 = vector.broadcast %cst_121 : f32 to vector<8x32xf32>
    %442 = arith.mulf %441, %440 : vector<8x32xf32>
    %443 = math.tanh %442 : vector<8x32xf32>
    %cst_122 = arith.constant 1.000000e+00 : f32
    %444 = vector.broadcast %cst_122 : f32 to vector<8x32xf32>
    %445 = arith.addf %443, %444 : vector<8x32xf32>
    %cst_123 = arith.constant 5.000000e-01 : f32
    %446 = vector.broadcast %cst_123 : f32 to vector<8x32xf32>
    %447 = arith.mulf %446, %445 : vector<8x32xf32>
    %448 = vector.extract_strided_slice %434 {offsets = [0, 32], sizes = [8, 32], strides = [1, 1]} : vector<8x96xf32> to vector<8x32xf32>
    %449 = vector.extract_strided_slice %437 {offsets = [0, 32], sizes = [8, 32], strides = [1, 1]} : vector<8x96xf32> to vector<8x32xf32>
    %450 = arith.addf %448, %449 : vector<8x32xf32>
    %cst_124 = arith.constant 5.000000e-01 : f32
    %451 = vector.broadcast %cst_124 : f32 to vector<8x32xf32>
    %452 = arith.mulf %451, %450 : vector<8x32xf32>
    %453 = math.tanh %452 : vector<8x32xf32>
    %cst_125 = arith.constant 1.000000e+00 : f32
    %454 = vector.broadcast %cst_125 : f32 to vector<8x32xf32>
    %455 = arith.addf %453, %454 : vector<8x32xf32>
    %cst_126 = arith.constant 5.000000e-01 : f32
    %456 = vector.broadcast %cst_126 : f32 to vector<8x32xf32>
    %457 = arith.mulf %456, %455 : vector<8x32xf32>
    %458 = vector.extract_strided_slice %434 {offsets = [0, 64], sizes = [8, 32], strides = [1, 1]} : vector<8x96xf32> to vector<8x32xf32>
    %459 = vector.extract_strided_slice %437 {offsets = [0, 64], sizes = [8, 32], strides = [1, 1]} : vector<8x96xf32> to vector<8x32xf32>
    %460 = arith.mulf %447, %459 : vector<8x32xf32>
    %461 = arith.addf %458, %460 : vector<8x32xf32>
    %462 = math.tanh %461 : vector<8x32xf32>
    %cst_127 = arith.constant 1.000000e+00 : f32
    %463 = vector.broadcast %cst_127 : f32 to vector<8x32xf32>
    %464 = arith.subf %463, %457 : vector<8x32xf32>
    %465 = arith.mulf %464, %462 : vector<8x32xf32>
    %466 = arith.mulf %457, %397 : vector<8x32xf32>
    %467 = arith.addf %465, %466 : vector<8x32xf32>
    %cst_128 = arith.constant dense<0.000000e+00> : vector<8x96xf32>
    %468 = tpu.matmul %467, %3, %cst_128 {dimension_numbers = #tpu.dot_dimension_numbers<[1], [0], [0], [1], [0, 0, 1, 1], [], []>} : vector<8x32xf32>, vector<32x96xf32>, vector<8x96xf32> -> vector<8x96xf32>
    %469 = vector.broadcast %7 : vector<1x96xf32> to vector<8x96xf32>
    %470 = arith.addf %468, %469 : vector<8x96xf32>
    %cst_129 = arith.constant dense<0.000000e+00> : vector<8x96xf32>
    %471 = tpu.matmul %433, %4, %cst_129 {dimension_numbers = #tpu.dot_dimension_numbers<[1], [0], [0], [1], [0, 0, 1, 1], [], []>} : vector<8x32xf32>, vector<32x96xf32>, vector<8x96xf32> -> vector<8x96xf32>
    %472 = vector.broadcast %8 : vector<1x96xf32> to vector<8x96xf32>
    %473 = arith.addf %471, %472 : vector<8x96xf32>
    %474 = vector.extract_strided_slice %470 {offsets = [0, 0], sizes = [8, 32], strides = [1, 1]} : vector<8x96xf32> to vector<8x32xf32>
    %475 = vector.extract_strided_slice %473 {offsets = [0, 0], sizes = [8, 32], strides = [1, 1]} : vector<8x96xf32> to vector<8x32xf32>
    %476 = arith.addf %474, %475 : vector<8x32xf32>
    %cst_130 = arith.constant 5.000000e-01 : f32
    %477 = vector.broadcast %cst_130 : f32 to vector<8x32xf32>
    %478 = arith.mulf %477, %476 : vector<8x32xf32>
    %479 = math.tanh %478 : vector<8x32xf32>
    %cst_131 = arith.constant 1.000000e+00 : f32
    %480 = vector.broadcast %cst_131 : f32 to vector<8x32xf32>
    %481 = arith.addf %479, %480 : vector<8x32xf32>
    %cst_132 = arith.constant 5.000000e-01 : f32
    %482 = vector.broadcast %cst_132 : f32 to vector<8x32xf32>
    %483 = arith.mulf %482, %481 : vector<8x32xf32>
    %484 = vector.extract_strided_slice %470 {offsets = [0, 32], sizes = [8, 32], strides = [1, 1]} : vector<8x96xf32> to vector<8x32xf32>
    %485 = vector.extract_strided_slice %473 {offsets = [0, 32], sizes = [8, 32], strides = [1, 1]} : vector<8x96xf32> to vector<8x32xf32>
    %486 = arith.addf %484, %485 : vector<8x32xf32>
    %cst_133 = arith.constant 5.000000e-01 : f32
    %487 = vector.broadcast %cst_133 : f32 to vector<8x32xf32>
    %488 = arith.mulf %487, %486 : vector<8x32xf32>
    %489 = math.tanh %488 : vector<8x32xf32>
    %cst_134 = arith.constant 1.000000e+00 : f32
    %490 = vector.broadcast %cst_134 : f32 to vector<8x32xf32>
    %491 = arith.addf %489, %490 : vector<8x32xf32>
    %cst_135 = arith.constant 5.000000e-01 : f32
    %492 = vector.broadcast %cst_135 : f32 to vector<8x32xf32>
    %493 = arith.mulf %492, %491 : vector<8x32xf32>
    %494 = vector.extract_strided_slice %470 {offsets = [0, 64], sizes = [8, 32], strides = [1, 1]} : vector<8x96xf32> to vector<8x32xf32>
    %495 = vector.extract_strided_slice %473 {offsets = [0, 64], sizes = [8, 32], strides = [1, 1]} : vector<8x96xf32> to vector<8x32xf32>
    %496 = arith.mulf %483, %495 : vector<8x32xf32>
    %497 = arith.addf %494, %496 : vector<8x32xf32>
    %498 = math.tanh %497 : vector<8x32xf32>
    %cst_136 = arith.constant 1.000000e+00 : f32
    %499 = vector.broadcast %cst_136 : f32 to vector<8x32xf32>
    %500 = arith.subf %499, %493 : vector<8x32xf32>
    %501 = arith.mulf %500, %498 : vector<8x32xf32>
    %502 = arith.mulf %493, %433 : vector<8x32xf32>
    %503 = arith.addf %501, %502 : vector<8x32xf32>
    %504 = vector.extract_strided_slice %11 {offsets = [56, 0], sizes = [8, 96], strides = [1, 1]} : vector<64x96xf32> to vector<8x96xf32>
    %cst_137 = arith.constant dense<0.000000e+00> : vector<8x96xf32>
    %505 = tpu.matmul %467, %2, %cst_137 {dimension_numbers = #tpu.dot_dimension_numbers<[1], [0], [0], [1], [0, 0, 1, 1], [], []>} : vector<8x32xf32>, vector<32x96xf32>, vector<8x96xf32> -> vector<8x96xf32>
    %506 = vector.broadcast %6 : vector<1x96xf32> to vector<8x96xf32>
    %507 = arith.addf %505, %506 : vector<8x96xf32>
    %508 = vector.extract_strided_slice %504 {offsets = [0, 0], sizes = [8, 32], strides = [1, 1]} : vector<8x96xf32> to vector<8x32xf32>
    %509 = vector.extract_strided_slice %507 {offsets = [0, 0], sizes = [8, 32], strides = [1, 1]} : vector<8x96xf32> to vector<8x32xf32>
    %510 = arith.addf %508, %509 : vector<8x32xf32>
    %cst_138 = arith.constant 5.000000e-01 : f32
    %511 = vector.broadcast %cst_138 : f32 to vector<8x32xf32>
    %512 = arith.mulf %511, %510 : vector<8x32xf32>
    %513 = math.tanh %512 : vector<8x32xf32>
    %cst_139 = arith.constant 1.000000e+00 : f32
    %514 = vector.broadcast %cst_139 : f32 to vector<8x32xf32>
    %515 = arith.addf %513, %514 : vector<8x32xf32>
    %cst_140 = arith.constant 5.000000e-01 : f32
    %516 = vector.broadcast %cst_140 : f32 to vector<8x32xf32>
    %517 = arith.mulf %516, %515 : vector<8x32xf32>
    %518 = vector.extract_strided_slice %504 {offsets = [0, 32], sizes = [8, 32], strides = [1, 1]} : vector<8x96xf32> to vector<8x32xf32>
    %519 = vector.extract_strided_slice %507 {offsets = [0, 32], sizes = [8, 32], strides = [1, 1]} : vector<8x96xf32> to vector<8x32xf32>
    %520 = arith.addf %518, %519 : vector<8x32xf32>
    %cst_141 = arith.constant 5.000000e-01 : f32
    %521 = vector.broadcast %cst_141 : f32 to vector<8x32xf32>
    %522 = arith.mulf %521, %520 : vector<8x32xf32>
    %523 = math.tanh %522 : vector<8x32xf32>
    %cst_142 = arith.constant 1.000000e+00 : f32
    %524 = vector.broadcast %cst_142 : f32 to vector<8x32xf32>
    %525 = arith.addf %523, %524 : vector<8x32xf32>
    %cst_143 = arith.constant 5.000000e-01 : f32
    %526 = vector.broadcast %cst_143 : f32 to vector<8x32xf32>
    %527 = arith.mulf %526, %525 : vector<8x32xf32>
    %528 = vector.extract_strided_slice %504 {offsets = [0, 64], sizes = [8, 32], strides = [1, 1]} : vector<8x96xf32> to vector<8x32xf32>
    %529 = vector.extract_strided_slice %507 {offsets = [0, 64], sizes = [8, 32], strides = [1, 1]} : vector<8x96xf32> to vector<8x32xf32>
    %530 = arith.mulf %517, %529 : vector<8x32xf32>
    %531 = arith.addf %528, %530 : vector<8x32xf32>
    %532 = math.tanh %531 : vector<8x32xf32>
    %cst_144 = arith.constant 1.000000e+00 : f32
    %533 = vector.broadcast %cst_144 : f32 to vector<8x32xf32>
    %534 = arith.subf %533, %527 : vector<8x32xf32>
    %535 = arith.mulf %534, %532 : vector<8x32xf32>
    %536 = arith.mulf %527, %467 : vector<8x32xf32>
    %537 = arith.addf %535, %536 : vector<8x32xf32>
    %cst_145 = arith.constant dense<0.000000e+00> : vector<8x96xf32>
    %538 = tpu.matmul %537, %3, %cst_145 {dimension_numbers = #tpu.dot_dimension_numbers<[1], [0], [0], [1], [0, 0, 1, 1], [], []>} : vector<8x32xf32>, vector<32x96xf32>, vector<8x96xf32> -> vector<8x96xf32>
    %539 = vector.broadcast %7 : vector<1x96xf32> to vector<8x96xf32>
    %540 = arith.addf %538, %539 : vector<8x96xf32>
    %cst_146 = arith.constant dense<0.000000e+00> : vector<8x96xf32>
    %541 = tpu.matmul %503, %4, %cst_146 {dimension_numbers = #tpu.dot_dimension_numbers<[1], [0], [0], [1], [0, 0, 1, 1], [], []>} : vector<8x32xf32>, vector<32x96xf32>, vector<8x96xf32> -> vector<8x96xf32>
    %542 = vector.broadcast %8 : vector<1x96xf32> to vector<8x96xf32>
    %543 = arith.addf %541, %542 : vector<8x96xf32>
    %544 = vector.extract_strided_slice %540 {offsets = [0, 0], sizes = [8, 32], strides = [1, 1]} : vector<8x96xf32> to vector<8x32xf32>
    %545 = vector.extract_strided_slice %543 {offsets = [0, 0], sizes = [8, 32], strides = [1, 1]} : vector<8x96xf32> to vector<8x32xf32>
    %546 = arith.addf %544, %545 : vector<8x32xf32>
    %cst_147 = arith.constant 5.000000e-01 : f32
    %547 = vector.broadcast %cst_147 : f32 to vector<8x32xf32>
    %548 = arith.mulf %547, %546 : vector<8x32xf32>
    %549 = math.tanh %548 : vector<8x32xf32>
    %cst_148 = arith.constant 1.000000e+00 : f32
    %550 = vector.broadcast %cst_148 : f32 to vector<8x32xf32>
    %551 = arith.addf %549, %550 : vector<8x32xf32>
    %cst_149 = arith.constant 5.000000e-01 : f32
    %552 = vector.broadcast %cst_149 : f32 to vector<8x32xf32>
    %553 = arith.mulf %552, %551 : vector<8x32xf32>
    %554 = vector.extract_strided_slice %540 {offsets = [0, 32], sizes = [8, 32], strides = [1, 1]} : vector<8x96xf32> to vector<8x32xf32>
    %555 = vector.extract_strided_slice %543 {offsets = [0, 32], sizes = [8, 32], strides = [1, 1]} : vector<8x96xf32> to vector<8x32xf32>
    %556 = arith.addf %554, %555 : vector<8x32xf32>
    %cst_150 = arith.constant 5.000000e-01 : f32
    %557 = vector.broadcast %cst_150 : f32 to vector<8x32xf32>
    %558 = arith.mulf %557, %556 : vector<8x32xf32>
    %559 = math.tanh %558 : vector<8x32xf32>
    %cst_151 = arith.constant 1.000000e+00 : f32
    %560 = vector.broadcast %cst_151 : f32 to vector<8x32xf32>
    %561 = arith.addf %559, %560 : vector<8x32xf32>
    %cst_152 = arith.constant 5.000000e-01 : f32
    %562 = vector.broadcast %cst_152 : f32 to vector<8x32xf32>
    %563 = arith.mulf %562, %561 : vector<8x32xf32>
    %564 = vector.extract_strided_slice %540 {offsets = [0, 64], sizes = [8, 32], strides = [1, 1]} : vector<8x96xf32> to vector<8x32xf32>
    %565 = vector.extract_strided_slice %543 {offsets = [0, 64], sizes = [8, 32], strides = [1, 1]} : vector<8x96xf32> to vector<8x32xf32>
    %566 = arith.mulf %553, %565 : vector<8x32xf32>
    %567 = arith.addf %564, %566 : vector<8x32xf32>
    %568 = math.tanh %567 : vector<8x32xf32>
    %cst_153 = arith.constant 1.000000e+00 : f32
    %569 = vector.broadcast %cst_153 : f32 to vector<8x32xf32>
    %570 = arith.subf %569, %563 : vector<8x32xf32>
    %571 = arith.mulf %570, %568 : vector<8x32xf32>
    %572 = arith.mulf %563, %503 : vector<8x32xf32>
    %573 = arith.addf %571, %572 : vector<8x32xf32>
    %cst_154 = arith.constant dense<0.000000e+00> : vector<8xf32>
    %574 = vector.multi_reduction <add>, %573, %cst_154 [1] : vector<8x32xf32> to vector<8xf32>
    %575 = vector.shape_cast %574 : vector<8xf32> to vector<8x1xf32>
    %cst_155 = arith.constant 3.200000e+01 : f32
    %576 = vector.broadcast %cst_155 : f32 to vector<8x1xf32>
    %577 = arith.divf %575, %576 : vector<8x1xf32>
    %578 = vector.broadcast %577 : vector<8x1xf32> to vector<8x32xf32>
    %579 = arith.subf %573, %578 : vector<8x32xf32>
    %580 = arith.mulf %579, %579 : vector<8x32xf32>
    %cst_156 = arith.constant dense<0.000000e+00> : vector<8xf32>
    %581 = vector.multi_reduction <add>, %580, %cst_156 [1] : vector<8x32xf32> to vector<8xf32>
    %582 = vector.shape_cast %581 : vector<8xf32> to vector<8x1xf32>
    %cst_157 = arith.constant 3.200000e+01 : f32
    %583 = vector.broadcast %cst_157 : f32 to vector<8x1xf32>
    %584 = arith.divf %582, %583 : vector<8x1xf32>
    %cst_158 = arith.constant 9.99999974E-6 : f32
    %585 = vector.broadcast %cst_158 : f32 to vector<8x1xf32>
    %586 = arith.addf %584, %585 : vector<8x1xf32>
    %587 = math.rsqrt %586 : vector<8x1xf32>
    %588 = vector.broadcast %587 : vector<8x1xf32> to vector<8x32xf32>
    %589 = arith.mulf %579, %588 : vector<8x32xf32>
    %c0_159 = arith.constant 0 : index
    %c0_160 = arith.constant 0 : index
    %590 = vector.load %arg7[%c0_159, %c0_160] : memref<2x32xf32, #tpu.memory_space<vmem>>, vector<1x32xf32>
    %591 = vector.broadcast %590 : vector<1x32xf32> to vector<8x32xf32>
    %592 = arith.mulf %589, %591 : vector<8x32xf32>
    %c1_161 = arith.constant 1 : index
    %c0_162 = arith.constant 0 : index
    %593 = vector.load %arg7[%c1_161, %c0_162] : memref<2x32xf32, #tpu.memory_space<vmem>>, vector<1x32xf32>
    %594 = vector.broadcast %593 : vector<1x32xf32> to vector<8x32xf32>
    %595 = arith.addf %592, %594 : vector<8x32xf32>
    %c0_163 = arith.constant 0 : index
    %c0_164 = arith.constant 0 : index
    %596 = vector.load %arg8[%c0_163, %c0_164] : memref<8x32xf32, #tpu.memory_space<vmem>>, vector<8x32xf32>
    tpu.vector_store %arg8[%c0_163, %c0_164], %595 {strides = array<i32>} : memref<8x32xf32, #tpu.memory_space<vmem>>, vector<8x32xf32>,
    return
  }
}

</mosaic_0001>

<bundles_post_ra>
// kernel: forward.1
= control target key start
LH: loop header
LB: loop body
LE: loop exit
PB: predicated region body
PF: predicated region fallthrough
CT: control target
= control target key end

     0   :  { %vm55_vm0 = vcmask 64512   ;;  %v1236_v6 = vmov 0.0   ;;  %s1237_s17 = smov 64   ;;  %s1238_s20 = smov 96   ;;  %vm122_vm1 = vcmask 261120   ;;  %s1673_s2 = inlined_call_operand.vmem [shape: f32[32,96], index: 2, kind: input, shape index: {}]   ;;  %s1674_s1 = inlined_call_operand.vmem [shape: f32[8,96], index: 1, kind: input, shape index: {}]   ;;  %s1675_s0 = inlined_call_operand.vmem [shape: f32[64,8], index: 0, kind: input, shape index: {}]   ;;  %s1676_s3 = inlined_call_operand.vmem [shape: f32[2,96], index: 3, kind: input, shape index: {}]   ;;  %s1677_s5 = inlined_call_operand.vmem [shape: f32[32,96], index: 5, kind: input, shape index: {}]   ;;  %s1678_s4 = inlined_call_operand.vmem [shape: f32[32,96], index: 4, kind: input, shape index: {}]   ;;  %s1679_s6 = inlined_call_operand.vmem [shape: f32[2,96], index: 6, kind: input, shape index: {}]   ;;  %s1680_s7 = inlined_call_operand.vmem [shape: f32[2,32], index: 7, kind: input, shape index: {}]   ;;  %s1681_s8 = inlined_call_operand.vmem [shape: f32[8,32], index: 8, kind: output, shape index: {}]  }
   0x1   :  { %v1289_v0 = vld [vmem:[%s1673_s2 + $0x18] sm:$0xff]  ;;  %v1294_v1 = vld [vmem:[%s1673_s2 + $0x10] sm:$0xff]  ;;  %v37_v2 = vld [vmem:[%s1674_s1] sm:$0xff]  ;;  %s1240_s28 = smov 32  }
   0x2   :  { %138 = vmatpush.msra.mxu1 %v1289_v0  ;;  %v29_v3 = vld [vmem:[%s1675_s0] sm:$0xff]  ;;  %v1306_v4 = vld [vmem:[%s1673_s2 + $0x8] sm:$0xff]  ;;  %95 = vmatpush.msra.mxu0 %v37_v2  ;;  %v1343_v23 = vld [vmem:[%s1677_s5 + $0x18] sm:$0xff] }
   0x3   :  { %1127 = vmatmul.msk.f32.vlgmr.msra.gmra.mxu0 %vm55_vm0, %v29_v3  ;;  %v1313_v5 = vld [vmem:[%s1673_s2] sm:$0xff]  ;;  %v1348_v24 = vld [vmem:[%s1677_s5 + $0x10] sm:$0xff]  ;;  %209 = vmatpush.msra.mxu3 %v1343_v23  ;;  %v1354_v25 = vld [vmem:[%s1678_s4 + $0x18] sm:$0xff] }
   0x4   :  { %139 = vmatpush.msra.mxu1 %v1294_v1  ;;  %v1328_v7 = vld [vmem:[%s1676_s3 + $0x1] ss:$0 sm:$0xff]  ;;  %v1335_v10 = vld [vmem:[%s1676_s3] ss:$0 sm:$0xff]  ;;  %v1359_v26 = vld [vmem:[%s1678_s4 + $0x10] sm:$0xff]  ;;  %188 = vmatpush.msra.mxu2 %v1354_v25 }
   0x5   :  { %v1364_v27 = vld [vmem:[%s1677_s5 + $0x8] sm:$0xff]  ;;  %210 = vmatpush.msra.mxu3 %v1348_v24  ;;  %v1376_v29 = vld [vmem:[%s1677_s5] sm:$0xff] }
   0x6   :  { %140 = vmatpush.msra.mxu1 %v1306_v4  ;;  %v1371_v28 = vld [vmem:[%s1678_s4 + $0x8] sm:$0xff]  ;;  %189 = vmatpush.msra.mxu2 %v1359_v26  ;;  %v1383_v30 = vld [vmem:[%s1678_s4] sm:$0xff] }
   0x7   :  { %211 = vmatpush.msra.mxu3 %v1364_v27  ;;  %v30_v36 = vld [vmem:[%s1675_s0 + $0x8] sm:$0xff]  ;;  %v1411_v37 = vld [vmem:[%s1679_s6 + $0x1] ss:$0 sm:$0xff]  ;;  %v1430_v43 = vld [vmem:[%s1679_s6] ss:$0 sm:$0xff] }
   0x8   :  { %141 = vmatpush.msra.mxu1 %v1313_v5  ;;  %190 = vmatpush.msra.mxu2 %v1371_v28 }
   0x9   :  { %142 = vmatmul.f32.vlgmr.msra.gmra.mxu1 %v1236_v6  ;;  %212 = vmatpush.msra.mxu3 %v1376_v29 }
   0xa   :  { %253 = vmatpush.msrb.mxu1 %v1289_v0  ;;  %213 = vmatmul.f32.vlgmr.msra.gmra.mxu3 %v1236_v6 }
   0xb   :  { %191 = vmatpush.msra.mxu2 %v1383_v30  ;;  %327 = vmatpush.msrb.mxu3 %v1343_v23 }
   0xc   :  { %254 = vmatpush.msrb.mxu1 %v1294_v1  ;;  %1128 = vmatmul.msk.f32.gmra.mxu0 %vm55_vm0, %v30_v36 }
   0xd   :  { %302 = vmatpush.msrb.mxu2 %v1354_v25  ;;  %328 = vmatpush.msrb.mxu3 %v1348_v24 }
   0xe   :  { %255 = vmatpush.msrb.mxu1 %v1306_v4 }
   0xf   :  { %303 = vmatpush.msrb.mxu2 %v1359_v26  ;;  %329 = vmatpush.msrb.mxu3 %v1364_v27 }
  0x10   :  { %256 = vmatpush.msrb.mxu1 %v1313_v5 }
  0x11   :  { %304 = vmatpush.msrb.mxu2 %v1371_v28  ;;  %330 = vmatpush.msrb.mxu3 %v1376_v29 }
  0x12   :  { %371 = vmatpush.msra.mxu1 %v1289_v0 }
  0x13   :  { %305 = vmatpush.msrb.mxu2 %v1383_v30  ;;  %445 = vmatpush.msra.mxu3 %v1343_v23 }
  0x14   :  { %372 = vmatpush.msra.mxu1 %v1294_v1 }
  0x15   :  { %446 = vmatpush.msra.mxu3 %v1348_v24 }
  0x16   :  { %373 = vmatpush.msra.mxu1 %v1306_v4 }
  0x17   :  { %447 = vmatpush.msra.mxu3 %v1364_v27 }
  0x18   :  { %374 = vmatpush.msra.mxu1 %v1313_v5 }
  0x19   :  { %448 = vmatpush.msra.mxu3 %v1376_v29 }
  0x80   :  { %v97_v11 = vpop.f32.mrf.mxu0 }
  0x81   :  { %v98_v12 = vadd.f32 %v1335_v10, %v97_v11 }
  0x86   :  { %v143_v8 = vpop.f32.mrf.mxu1 }
  0x87   :  { %v144_v9 = vadd.f32 %v1328_v7, %v143_v8 }
  0x89   :  { %152 = vrot.lane.b32.xlu0 %v144_v9, %s1237_s17  ;;  %v146_v13 = vadd.f32 %v144_v9, %v98_v12  ;;  %v100_v53 = vpop.f32.mrf.mxu0 }
  0x8a   :  { %v101_v54 = vadd.f32 %v1335_v10, %v100_v53 }
  0x8b   :  { %v147_v14 = vmul.f32 0.5, %v146_v13 }
  0x8d   :  { %1168 = vtanh.f32 %v147_v14  ;;  %v214_v38 = vpop.f32.mrf.mxu3 }
  0x8e   :  { %v215_v39 = vadd.f32 %v1411_v37, %v214_v38 }
  0x90   :  { %223 = vrot.lane.b32.xlu2 %v215_v39, %s1237_s17 }
  0x93   :  { %v1169_v15 = vpop.eup %1168 }
  0x94   :  { %v149_v16 = vadd.f32 1.0, %v1169_v15 }
  0x96   :  { %v150_v17 = vmul.f32 0.5, %v149_v16 }
  0x98   :  { %v162_v31 = vsub.f32 1.0, %v150_v17  ;;  %v168_v33 = vmul.f32 0.0, %v150_v17 }
  0xea   :  { %v224_v50 = vpop.permute.xlu2 %223 }
  0xfb   :  { %v153_v18 = vpop.permute.xlu0 %152 }
  0xfc   :  { %v155_v19 = vmul.f32 %v153_v18, %v150_v17 }
  0xfe   :  { %157 = vrot.lane.b32.xlu0 %v155_v19, %s1237_s17 }
 0x170   :  { %v158_v20 = vpop.permute.xlu0 %157 }
 0x171   :  { %v160_v21 = vadd.f32 %v158_v20, %v98_v12 }
 0x173   :  { %1170 = vtanh.f32 %v160_v21  ;;  %v31_v21 = vld [vmem:[%s1675_s0 + $0x10] sm:$0xff] }
 0x174   :  { %1129 = vmatmul.msk.f32.gmra.mxu0 %vm55_vm0, %v31_v21 }
 0x179   :  { %v1171_v22 = vpop.eup %1170 }
 0x17a   :  { %164 = vrot.lane.b32.xlu1 %v1171_v22, %s1238_s20 }
 0x1ec   :  { %v165_v32 = vpop.permute.xlu1 %164 }
 0x1ed   :  { %v167_v34 = vmul.f32 %v165_v32, %v162_v31 }
 0x1ef   :  { %v1400_v35 = vadd.f32 %v168_v33, %v167_v34 }
 0x1f1   :  { %172 = vrot.lane.b32.xlu1 %v1400_v35, %s1238_s20 }
 0x263   :  { %v173_v40 = vpop.permute.xlu1 %172 }
 0x264   :  { %1135 = vmatmul.msk.f32.vlgmr.msra.gmra.mxu2 %vm122_vm1, %v173_v40  ;;  %1136 = vmatmul.msk.f32.vlgmr.msrb.gmra.mxu1 %vm122_vm1, %v173_v40 }
 0x265   :  { %420 = vmatpush.msra.mxu2 %v1354_v25  ;;  %489 = vmatpush.msrb.mxu1 %v1289_v0 }
 0x267   :  { %421 = vmatpush.msra.mxu2 %v1359_v26  ;;  %490 = vmatpush.msrb.mxu1 %v1294_v1 }
 0x269   :  { %422 = vmatpush.msra.mxu2 %v1371_v28  ;;  %491 = vmatpush.msrb.mxu1 %v1306_v4 }
 0x26b   :  { %423 = vmatpush.msra.mxu2 %v1383_v30  ;;  %492 = vmatpush.msrb.mxu1 %v1313_v5 }
 0x2e1   :  { %v258_v41 = vpop.f32.mrf.mxu1 }
 0x2e2   :  { %v259_v42 = vadd.f32 %v1328_v7, %v258_v41 }
 0x2e4   :  { %267 = vrot.lane.b32.xlu2 %v259_v42, %s1237_s17  ;;  %v261_v55 = vadd.f32 %v259_v42, %v101_v54 }
 0x2e6   :  { %v262_v56 = vmul.f32 0.5, %v261_v55 }
 0x2e7   :  { %v193_v44 = vpop.f32.mrf.mxu2 }
 0x2e8   :  { %v194_v45 = vadd.f32 %v1430_v43, %v193_v44 }
 0x2ea   :  { %v217_v46 = vadd.f32 %v215_v39, %v194_v45 }
 0x2ec   :  { %v218_v47 = vmul.f32 0.5, %v217_v46  ;;  %v103_v46 = vpop.f32.mrf.mxu0 }
 0x2ee   :  { %1172 = vtanh.f32 %v218_v47  ;;  %v104_v47 = vadd.f32 %v1335_v10, %v103_v46 }
 0x2ef   :  { %1174 = vtanh.f32 %v262_v56 }
 0x2f4   :  { %v1173_v48 = vpop.eup %1172 }
 0x2f5   :  { %v220_v49 = vadd.f32 1.0, %v1173_v48  ;;  %v1175_v57 = vpop.eup %1174 }
 0x2f6   :  { %v264_v58 = vadd.f32 1.0, %v1175_v57 }
 0x2f7   :  { %v221_v51 = vmul.f32 0.5, %v220_v49 }
 0x2f8   :  { %v265_v59 = vmul.f32 0.5, %v264_v58 }
 0x2f9   :  { %v226_v52 = vmul.f32 %v224_v50, %v221_v51  ;;  %v233_v9 = vsub.f32 1.0, %v221_v51  ;;  %v239_v12 = vmul.f32 0.0, %v221_v51 }
 0x2fa   :  { %v277_v15 = vsub.f32 1.0, %v265_v59  ;;  %v283_v17 = vmul.f32 %v265_v59, %v1400_v35 }
 0x2fb   :  { %228 = vrot.lane.b32.xlu0 %v226_v52, %s1237_s17 }
 0x33e   :  { %v268_v60 = vpop.permute.xlu2 %267 }
 0x33f   :  { %v270_v61 = vmul.f32 %v268_v60, %v265_v59 }
 0x341   :  { %272 = vrot.lane.b32.xlu1 %v270_v61, %s1237_s17 }
 0x36d   :  { %v229_v62 = vpop.permute.xlu0 %228 }
 0x36e   :  { %v231_v63 = vadd.f32 %v229_v62, %v194_v45 }
 0x370   :  { %1176 = vtanh.f32 %v231_v63 }
 0x376   :  { %v1177_v2 = vpop.eup %1176 }
 0x377   :  { %235 = vrot.lane.b32.xlu2 %v1177_v2, %s1238_s20 }
 0x3b3   :  { %v273_v3 = vpop.permute.xlu1 %272 }
 0x3b4   :  { %v275_v6 = vadd.f32 %v273_v3, %v101_v54 }
 0x3b6   :  { %1178 = vtanh.f32 %v275_v6 }
 0x3bc   :  { %v1179_v8 = vpop.eup %1178 }
 0x3bd   :  { %279 = vrot.lane.b32.xlu0 %v1179_v8, %s1238_s20 }
 0x3d1   :  { %v236_v11 = vpop.permute.xlu2 %235 }
 0x3d2   :  { %v238_v13 = vmul.f32 %v236_v11, %v233_v9 }
 0x3d4   :  { %v1438_v14 = vadd.f32 %v239_v12, %v238_v13 }
 0x3d6   :  { %311 = vrot.lane.b32.xlu1 %v1438_v14, %s1238_s20 }
 0x42f   :  { %v280_v16 = vpop.permute.xlu0 %279 }
 0x430   :  { %v282_v18 = vmul.f32 %v280_v16, %v277_v15 }
 0x432   :  { %v1443_v19 = vadd.f32 %v283_v17, %v282_v18 }
 0x434   :  { %286 = vrot.lane.b32.xlu2 %v1443_v19, %s1238_s20 }
 0x448   :  { %v312_v20 = vpop.permute.xlu1 %311 }
 0x449   :  { %1138 = vmatmul.msk.f32.vlgmr.msrb.gmra.mxu3 %vm122_vm1, %v312_v20 }
 0x44a   :  { %563 = vmatpush.msrb.mxu3 %v1343_v23 }
 0x44c   :  { %564 = vmatpush.msrb.mxu3 %v1348_v24 }
 0x44e   :  { %565 = vmatpush.msrb.mxu3 %v1364_v27 }
 0x450   :  { %566 = vmatpush.msrb.mxu3 %v1376_v29 }
 0x48e   :  { %v287_v22 = vpop.permute.xlu2 %286 }
 0x48f   :  { %1137 = vmatmul.msk.f32.vlgmr.msrb.gmra.mxu2 %vm122_vm1, %v287_v22  ;;  %1139 = vmatmul.msk.f32.vlgmr.msra.gmra.mxu1 %vm122_vm1, %v287_v22 }
 0x490   :  { %538 = vmatpush.msrb.mxu2 %v1354_v25  ;;  %607 = vmatpush.msra.mxu1 %v1289_v0 }
 0x492   :  { %539 = vmatpush.msrb.mxu2 %v1359_v26  ;;  %608 = vmatpush.msra.mxu1 %v1294_v1 }
 0x494   :  { %540 = vmatpush.msrb.mxu2 %v1371_v28  ;;  %609 = vmatpush.msra.mxu1 %v1306_v4 }
 0x496   :  { %541 = vmatpush.msrb.mxu2 %v1383_v30  ;;  %610 = vmatpush.msra.mxu1 %v1313_v5 }
 0x4cc   :  { %v332_v31 = vpop.f32.mrf.mxu3 }
 0x4cd   :  { %v333_v32 = vadd.f32 %v1411_v37, %v332_v31 }
 0x4cf   :  { %341 = vrot.lane.b32.xlu0 %v333_v32, %s1237_s17 }
 0x50c   :  { %v376_v33 = vpop.f32.mrf.mxu1 }
 0x50d   :  { %v377_v34 = vadd.f32 %v1328_v7, %v376_v33 }
 0x50f   :  { %385 = vrot.lane.b32.xlu1 %v377_v34, %s1237_s17  ;;  %v379_v48 = vadd.f32 %v377_v34, %v104_v47 }
 0x511   :  { %v380_v49 = vmul.f32 0.5, %v379_v48 }
 0x512   :  { %v307_v35 = vpop.f32.mrf.mxu2 }
 0x513   :  { %v308_v36 = vadd.f32 %v1430_v43, %v307_v35 }
 0x515   :  { %v335_v38 = vadd.f32 %v333_v32, %v308_v36 }
 0x517   :  { %v336_v39 = vmul.f32 0.5, %v335_v38 }
 0x519   :  { %1180 = vtanh.f32 %v336_v39 }
 0x51a   :  { %1182 = vtanh.f32 %v380_v49 }
 0x51f   :  { %v1181_v40 = vpop.eup %1180 }
 0x520   :  { %v338_v41 = vadd.f32 1.0, %v1181_v40  ;;  %v1183_v50 = vpop.eup %1182 }
 0x521   :  { %v382_v51 = vadd.f32 1.0, %v1183_v50 }
 0x522   :  { %v339_v42 = vmul.f32 0.5, %v338_v41 }
 0x523   :  { %v383_v52 = vmul.f32 0.5, %v382_v51 }
 0x524   :  { %v351_v61 = vsub.f32 1.0, %v339_v42  ;;  %v357_v63 = vmul.f32 %v339_v42, %v1438_v14  ;;  %v32_v14 = vld [vmem:[%s1675_s0 + $0x18] sm:$0xff] }
 0x525   :  { %v395_v6 = vsub.f32 1.0, %v383_v52  ;;  %v401_v9 = vmul.f32 %v383_v52, %v1443_v19  ;;  %1130 = vmatmul.msk.f32.gmra.mxu0 %vm55_vm0, %v32_v14 }
 0x541   :  { %v342_v44 = vpop.permute.xlu0 %341 }
 0x542   :  { %v344_v45 = vmul.f32 %v342_v44, %v339_v42 }
 0x544   :  { %346 = vrot.lane.b32.xlu2 %v344_v45, %s1237_s17 }
 0x581   :  { %v386_v53 = vpop.permute.xlu1 %385 }
 0x582   :  { %v388_v54 = vmul.f32 %v386_v53, %v383_v52 }
 0x584   :  { %390 = vrot.lane.b32.xlu0 %v388_v54, %s1237_s17 }
 0x59e   :  { %v347_v55 = vpop.permute.xlu2 %346 }
 0x59f   :  { %v349_v56 = vadd.f32 %v347_v55, %v308_v36 }
 0x5a1   :  { %1184 = vtanh.f32 %v349_v56 }
 0x5a2   :  { %v106_v38 = vpop.f32.mrf.mxu0 }
 0x5a3   :  { %v107_v39 = vadd.f32 %v1335_v10, %v106_v38 }
 0x5a7   :  { %v1185_v57 = vpop.eup %1184 }
 0x5a8   :  { %353 = vrot.lane.b32.xlu1 %v1185_v57, %s1238_s20 }
 0x5f6   :  { %v391_v58 = vpop.permute.xlu0 %390 }
 0x5f7   :  { %v393_v59 = vadd.f32 %v391_v58, %v104_v47 }
 0x5f9   :  { %1186 = vtanh.f32 %v393_v59 }
 0x5ff   :  { %v1187_v60 = vpop.eup %1186 }
 0x600   :  { %397 = vrot.lane.b32.xlu2 %v1187_v60, %s1238_s20 }
 0x61a   :  { %v354_v62 = vpop.permute.xlu1 %353 }
 0x61b   :  { %v356_v2 = vmul.f32 %v354_v62, %v351_v61 }
 0x61d   :  { %v1477_v3 = vadd.f32 %v357_v63, %v356_v2 }
 0x61f   :  { %429 = vrot.lane.b32.xlu0 %v1477_v3, %s1238_s20 }
 0x65a   :  { %v398_v8 = vpop.permute.xlu2 %397 }
 0x65b   :  { %v400_v11 = vmul.f32 %v398_v8, %v395_v6 }
 0x65d   :  { %v1482_v12 = vadd.f32 %v401_v9, %v400_v11 }
 0x65f   :  { %404 = vrot.lane.b32.xlu1 %v1482_v12, %s1238_s20 }
 0x691   :  { %v430_v13 = vpop.permute.xlu0 %429 }
 0x692   :  { %1141 = vmatmul.msk.f32.vlgmr.msra.gmra.mxu3 %vm122_vm1, %v430_v13 }
 0x693   :  { %681 = vmatpush.msra.mxu3 %v1343_v23 }
 0x695   :  { %682 = vmatpush.msra.mxu3 %v1348_v24 }
 0x697   :  { %683 = vmatpush.msra.mxu3 %v1364_v27 }
 0x699   :  { %684 = vmatpush.msra.mxu3 %v1376_v29 }
 0x6d1   :  { %v405_v15 = vpop.permute.xlu1 %404 }
 0x6d2   :  { %1140 = vmatmul.msk.f32.vlgmr.msra.gmra.mxu2 %vm122_vm1, %v405_v15  ;;  %1142 = vmatmul.msk.f32.vlgmr.msrb.gmra.mxu1 %vm122_vm1, %v405_v15 }
 0x6d3   :  { %656 = vmatpush.msra.mxu2 %v1354_v25  ;;  %725 = vmatpush.msrb.mxu1 %v1289_v0 }
 0x6d5   :  { %657 = vmatpush.msra.mxu2 %v1359_v26  ;;  %726 = vmatpush.msrb.mxu1 %v1294_v1 }
 0x6d7   :  { %658 = vmatpush.msra.mxu2 %v1371_v28  ;;  %727 = vmatpush.msrb.mxu1 %v1306_v4 }
 0x6d9   :  { %659 = vmatpush.msra.mxu2 %v1383_v30  ;;  %728 = vmatpush.msrb.mxu1 %v1313_v5 }
 0x715   :  { %v450_v16 = vpop.f32.mrf.mxu3 }
 0x716   :  { %v451_v17 = vadd.f32 %v1411_v37, %v450_v16 }
 0x718   :  { %459 = vrot.lane.b32.xlu2 %v451_v17, %s1237_s17 }
 0x74f   :  { %v494_v18 = vpop.f32.mrf.mxu1 }
 0x750   :  { %v495_v19 = vadd.f32 %v1328_v7, %v494_v18 }
 0x752   :  { %503 = vrot.lane.b32.xlu0 %v495_v19, %s1237_s17  ;;  %v497_v40 = vadd.f32 %v495_v19, %v107_v39 }
 0x754   :  { %v498_v41 = vmul.f32 0.5, %v497_v40 }
 0x755   :  { %v425_v20 = vpop.f32.mrf.mxu2 }
 0x756   :  { %v426_v21 = vadd.f32 %v1430_v43, %v425_v20 }
 0x758   :  { %v453_v22 = vadd.f32 %v451_v17, %v426_v21 }
 0x75a   :  { %v454_v31 = vmul.f32 0.5, %v453_v22 }
 0x75c   :  { %1188 = vtanh.f32 %v454_v31 }
 0x75d   :  { %1190 = vtanh.f32 %v498_v41 }
 0x762   :  { %v1189_v32 = vpop.eup %1188 }
 0x763   :  { %v456_v33 = vadd.f32 1.0, %v1189_v32  ;;  %v1191_v42 = vpop.eup %1190 }
 0x764   :  { %v500_v44 = vadd.f32 1.0, %v1191_v42 }
 0x765   :  { %v457_v34 = vmul.f32 0.5, %v456_v33 }
 0x766   :  { %v501_v45 = vmul.f32 0.5, %v500_v44 }
 0x767   :  { %v469_v54 = vsub.f32 1.0, %v457_v34  ;;  %v475_v56 = vmul.f32 %v457_v34, %v1477_v3  ;;  %v33_v3 = vld [vmem:[%s1675_s0 + $0x20] sm:$0xff] }
 0x768   :  { %v513_v59 = vsub.f32 1.0, %v501_v45  ;;  %v519_v61 = vmul.f32 %v501_v45, %v1482_v12  ;;  %1131 = vmatmul.msk.f32.gmra.mxu0 %vm55_vm0, %v33_v3 }
 0x772   :  { %v460_v35 = vpop.permute.xlu2 %459 }
 0x773   :  { %v462_v36 = vmul.f32 %v460_v35, %v457_v34 }
 0x775   :  { %464 = vrot.lane.b32.xlu1 %v462_v36, %s1237_s17 }
 0x7c4   :  { %v504_v46 = vpop.permute.xlu0 %503 }
 0x7c5   :  { %v506_v47 = vmul.f32 %v504_v46, %v501_v45 }
 0x7c7   :  { %508 = vrot.lane.b32.xlu2 %v506_v47, %s1237_s17 }
 0x7e5   :  { %v109_v22 = vpop.f32.mrf.mxu0 }
 0x7e6   :  { %v110_v31 = vadd.f32 %v1335_v10, %v109_v22 }
 0x7e7   :  { %v465_v48 = vpop.permute.xlu1 %464 }
 0x7e8   :  { %v467_v49 = vadd.f32 %v465_v48, %v426_v21 }
 0x7ea   :  { %1192 = vtanh.f32 %v467_v49 }
 0x7f0   :  { %v1193_v50 = vpop.eup %1192 }
 0x7f1   :  { %471 = vrot.lane.b32.xlu0 %v1193_v50, %s1238_s20 }
 0x821   :  { %v509_v51 = vpop.permute.xlu2 %508 }
 0x822   :  { %v511_v52 = vadd.f32 %v509_v51, %v107_v39 }
 0x824   :  { %1194 = vtanh.f32 %v511_v52 }
 0x82a   :  { %v1195_v53 = vpop.eup %1194 }
 0x82b   :  { %515 = vrot.lane.b32.xlu1 %v1195_v53, %s1238_s20 }
 0x863   :  { %v472_v55 = vpop.permute.xlu0 %471 }
 0x864   :  { %v474_v57 = vmul.f32 %v472_v55, %v469_v54 }
 0x866   :  { %v1516_v58 = vadd.f32 %v475_v56, %v474_v57 }
 0x868   :  { %547 = vrot.lane.b32.xlu2 %v1516_v58, %s1238_s20 }
 0x89d   :  { %v516_v60 = vpop.permute.xlu1 %515 }
 0x89e   :  { %v518_v62 = vmul.f32 %v516_v60, %v513_v59 }
 0x8a0   :  { %v1521_v63 = vadd.f32 %v519_v61, %v518_v62 }
 0x8a2   :  { %522 = vrot.lane.b32.xlu0 %v1521_v63, %s1238_s20 }
 0x8c2   :  { %v548_v2 = vpop.permute.xlu2 %547 }
 0x8c3   :  { %1144 = vmatmul.msk.f32.vlgmr.msrb.gmra.mxu3 %vm122_vm1, %v548_v2 }
 0x8c4   :  { %799 = vmatpush.msrb.mxu3 %v1343_v23 }
 0x8c6   :  { %800 = vmatpush.msrb.mxu3 %v1348_v24 }
 0x8c8   :  { %801 = vmatpush.msrb.mxu3 %v1364_v27 }
 0x8ca   :  { %802 = vmatpush.msrb.mxu3 %v1376_v29 }
 0x914   :  { %v523_v6 = vpop.permute.xlu0 %522 }
 0x915   :  { %1143 = vmatmul.msk.f32.vlgmr.msrb.gmra.mxu2 %vm122_vm1, %v523_v6  ;;  %1145 = vmatmul.msk.f32.vlgmr.msra.gmra.mxu1 %vm122_vm1, %v523_v6 }
 0x916   :  { %774 = vmatpush.msrb.mxu2 %v1354_v25  ;;  %843 = vmatpush.msra.mxu1 %v1289_v0 }
 0x918   :  { %775 = vmatpush.msrb.mxu2 %v1359_v26  ;;  %844 = vmatpush.msra.mxu1 %v1294_v1 }
 0x91a   :  { %776 = vmatpush.msrb.mxu2 %v1371_v28  ;;  %845 = vmatpush.msra.mxu1 %v1306_v4 }
 0x91c   :  { %777 = vmatpush.msrb.mxu2 %v1383_v30  ;;  %846 = vmatpush.msra.mxu1 %v1313_v5 }
 0x946   :  { %v568_v8 = vpop.f32.mrf.mxu3 }
 0x947   :  { %v569_v9 = vadd.f32 %v1411_v37, %v568_v8 }
 0x949   :  { %577 = vrot.lane.b32.xlu1 %v569_v9, %s1237_s17 }
 0x992   :  { %v612_v11 = vpop.f32.mrf.mxu1 }
 0x993   :  { %v613_v12 = vadd.f32 %v1328_v7, %v612_v11 }
 0x995   :  { %621 = vrot.lane.b32.xlu2 %v613_v12, %s1237_s17  ;;  %v615_v32 = vadd.f32 %v613_v12, %v110_v31 }
 0x997   :  { %v616_v33 = vmul.f32 0.5, %v615_v32 }
 0x998   :  { %v543_v13 = vpop.f32.mrf.mxu2 }
 0x999   :  { %v544_v14 = vadd.f32 %v1430_v43, %v543_v13 }
 0x99b   :  { %v571_v15 = vadd.f32 %v569_v9, %v544_v14 }
 0x99d   :  { %v572_v16 = vmul.f32 0.5, %v571_v15 }
 0x99f   :  { %1196 = vtanh.f32 %v572_v16 }
 0x9a0   :  { %1198 = vtanh.f32 %v616_v33 }
 0x9a5   :  { %v1197_v17 = vpop.eup %1196 }
 0x9a6   :  { %v574_v18 = vadd.f32 1.0, %v1197_v17  ;;  %v1199_v34 = vpop.eup %1198 }
 0x9a7   :  { %v618_v35 = vadd.f32 1.0, %v1199_v34 }
 0x9a8   :  { %v575_v19 = vmul.f32 0.5, %v574_v18 }
 0x9a9   :  { %v619_v36 = vmul.f32 0.5, %v618_v35 }
 0x9aa   :  { %v587_v47 = vsub.f32 1.0, %v575_v19  ;;  %v593_v49 = vmul.f32 %v575_v19, %v1516_v58  ;;  %v34_v58 = vld [vmem:[%s1675_s0 + $0x28] sm:$0xff] }
 0x9ab   :  { %v631_v52 = vsub.f32 1.0, %v619_v36  ;;  %v637_v54 = vmul.f32 %v619_v36, %v1521_v63  ;;  %1132 = vmatmul.msk.f32.gmra.mxu0 %vm55_vm0, %v34_v58 }
 0x9bb   :  { %v578_v20 = vpop.permute.xlu1 %577 }
 0x9bc   :  { %v580_v21 = vmul.f32 %v578_v20, %v575_v19 }
 0x9be   :  { %582 = vrot.lane.b32.xlu0 %v580_v21, %s1237_s17 }
 0x9ef   :  { %v622_v38 = vpop.permute.xlu2 %621 }
 0x9f0   :  { %v624_v39 = vmul.f32 %v622_v38, %v619_v36 }
 0x9f2   :  { %626 = vrot.lane.b32.xlu1 %v624_v39, %s1237_s17 }
 0xa28   :  { %v112_v11 = vpop.f32.mrf.mxu0 }
 0xa29   :  { %v113_v12 = vadd.f32 %v1335_v10, %v112_v11 }
 0xa30   :  { %v583_v40 = vpop.permute.xlu0 %582 }
 0xa31   :  { %v585_v41 = vadd.f32 %v583_v40, %v544_v14 }
 0xa33   :  { %1200 = vtanh.f32 %v585_v41 }
 0xa39   :  { %v1201_v42 = vpop.eup %1200 }
 0xa3a   :  { %589 = vrot.lane.b32.xlu2 %v1201_v42, %s1238_s20 }
 0xa64   :  { %v627_v44 = vpop.permute.xlu1 %626 }
 0xa65   :  { %v629_v45 = vadd.f32 %v627_v44, %v110_v31 }
 0xa67   :  { %1202 = vtanh.f32 %v629_v45 }
 0xa6d   :  { %v1203_v46 = vpop.eup %1202 }
 0xa6e   :  { %633 = vrot.lane.b32.xlu0 %v1203_v46, %s1238_s20 }
 0xa94   :  { %v590_v48 = vpop.permute.xlu2 %589 }
 0xa95   :  { %v592_v50 = vmul.f32 %v590_v48, %v587_v47  ;;  %v35_v47 = vld [vmem:[%s1675_s0 + $0x30] sm:$0xff] }
 0xa96   :  { %1133 = vmatmul.msk.f32.gmra.mxu0 %vm55_vm0, %v35_v47 }
 0xa97   :  { %v1555_v51 = vadd.f32 %v593_v49, %v592_v50 }
 0xa99   :  { %665 = vrot.lane.b32.xlu1 %v1555_v51, %s1238_s20 }
 0xae0   :  { %v634_v53 = vpop.permute.xlu0 %633 }
 0xae1   :  { %v636_v55 = vmul.f32 %v634_v53, %v631_v52 }
 0xae3   :  { %v1560_v56 = vadd.f32 %v637_v54, %v636_v55 }
 0xae5   :  { %640 = vrot.lane.b32.xlu2 %v1560_v56, %s1238_s20 }
 0xb0b   :  { %v666_v57 = vpop.permute.xlu1 %665 }
 0xb0c   :  { %1147 = vmatmul.msk.f32.vlgmr.msra.gmra.mxu3 %vm122_vm1, %v666_v57 }
 0xb0d   :  { %917 = vmatpush.msra.mxu3 %v1343_v23 }
 0xb0f   :  { %918 = vmatpush.msra.mxu3 %v1348_v24 }
 0xb11   :  { %919 = vmatpush.msra.mxu3 %v1364_v27 }
 0xb13   :  { %920 = vmatpush.msra.mxu3 %v1376_v29  ;;  %v115_v54 = vpop.f32.mrf.mxu0 }
 0xb14   :  { %v116_v55 = vadd.f32 %v1335_v10, %v115_v54 }
 0xb3f   :  { %v641_v59 = vpop.permute.xlu2 %640 }
 0xb40   :  { %1146 = vmatmul.msk.f32.vlgmr.msra.gmra.mxu2 %vm122_vm1, %v641_v59  ;;  %1148 = vmatmul.msk.f32.vlgmr.msrb.gmra.mxu1 %vm122_vm1, %v641_v59 }
 0xb41   :  { %892 = vmatpush.msra.mxu2 %v1354_v25  ;;  %961 = vmatpush.msrb.mxu1 %v1289_v0 }
 0xb43   :  { %893 = vmatpush.msra.mxu2 %v1359_v26  ;;  %962 = vmatpush.msrb.mxu1 %v1294_v1 }
 0xb45   :  { %894 = vmatpush.msra.mxu2 %v1371_v28  ;;  %963 = vmatpush.msrb.mxu1 %v1306_v4 }
 0xb47   :  { %895 = vmatpush.msra.mxu2 %v1383_v30  ;;  %964 = vmatpush.msrb.mxu1 %v1313_v5 }
 0xb8f   :  { %v686_v60 = vpop.f32.mrf.mxu3 }
 0xb90   :  { %v687_v61 = vadd.f32 %v1411_v37, %v686_v60 }
 0xb92   :  { %695 = vrot.lane.b32.xlu0 %v687_v61, %s1237_s17 }
 0xbbd   :  { %v730_v62 = vpop.f32.mrf.mxu1 }
 0xbbe   :  { %v731_v0 = vadd.f32 %v1328_v7, %v730_v62 }
 0xbc0   :  { %739 = vrot.lane.b32.xlu1 %v731_v0, %s1237_s17  ;;  %v733_v13 = vadd.f32 %v731_v0, %v113_v12 }
 0xbc2   :  { %v734_v14 = vmul.f32 0.5, %v733_v13 }
 0xbc3   :  { %v661_v63 = vpop.f32.mrf.mxu2 }
 0xbc4   :  { %v662_v1 = vadd.f32 %v1430_v43, %v661_v63 }
 0xbc6   :  { %v689_v2 = vadd.f32 %v687_v61, %v662_v1 }
 0xbc8   :  { %v690_v3 = vmul.f32 0.5, %v689_v2 }
 0xbca   :  { %1204 = vtanh.f32 %v690_v3 }
 0xbcb   :  { %1206 = vtanh.f32 %v734_v14 }
 0xbd0   :  { %v1205_v4 = vpop.eup %1204 }
 0xbd1   :  { %v692_v6 = vadd.f32 1.0, %v1205_v4  ;;  %v1207_v15 = vpop.eup %1206 }
 0xbd2   :  { %v736_v16 = vadd.f32 1.0, %v1207_v15 }
 0xbd3   :  { %v693_v8 = vmul.f32 0.5, %v692_v6 }
 0xbd4   :  { %v737_v17 = vmul.f32 0.5, %v736_v16 }
 0xbd5   :  { %v705_v34 = vsub.f32 1.0, %v693_v8  ;;  %v711_v36 = vmul.f32 %v693_v8, %v1555_v51 }
 0xbd6   :  { %v749_v40 = vsub.f32 1.0, %v737_v17  ;;  %v755_v42 = vmul.f32 %v737_v17, %v1560_v56 }
 0xc04   :  { %v696_v5 = vpop.permute.xlu0 %695 }
 0xc05   :  { %v698_v9 = vmul.f32 %v696_v5, %v693_v8 }
 0xc07   :  { %700 = vrot.lane.b32.xlu2 %v698_v9, %s1237_s17 }
 0xc32   :  { %v740_v18 = vpop.permute.xlu1 %739 }
 0xc33   :  { %v742_v19 = vmul.f32 %v740_v18, %v737_v17  ;;  %v36_v18 = vld [vmem:[%s1675_s0 + $0x38] sm:$0xff] }
 0xc34   :  { %1134 = vmatmul.msk.f32.gmra.mxu0 %vm55_vm0, %v36_v18 }
 0xc35   :  { %744 = vrot.lane.b32.xlu0 %v742_v19, %s1237_s17 }
 0xc61   :  { %v701_v20 = vpop.permute.xlu2 %700 }
 0xc62   :  { %v703_v21 = vadd.f32 %v701_v20, %v662_v1 }
 0xc64   :  { %1208 = vtanh.f32 %v703_v21 }
 0xc6a   :  { %v1209_v22 = vpop.eup %1208 }
 0xc6b   :  { %707 = vrot.lane.b32.xlu1 %v1209_v22, %s1238_s20 }
 0xca7   :  { %v745_v31 = vpop.permute.xlu0 %744 }
 0xca8   :  { %v747_v32 = vadd.f32 %v745_v31, %v113_v12 }
 0xcaa   :  { %1210 = vtanh.f32 %v747_v32 }
 0xcb0   :  { %v1211_v33 = vpop.eup %1210 }
 0xcb1   :  { %751 = vrot.lane.b32.xlu2 %v1211_v33, %s1238_s20 }
 0xcdd   :  { %v708_v35 = vpop.permute.xlu1 %707 }
 0xcde   :  { %v710_v38 = vmul.f32 %v708_v35, %v705_v34 }
 0xce0   :  { %v1594_v39 = vadd.f32 %v711_v36, %v710_v38 }
 0xce2   :  { %783 = vrot.lane.b32.xlu0 %v1594_v39, %s1238_s20 }
 0xd0b   :  { %v752_v41 = vpop.permute.xlu2 %751 }
 0xd0c   :  { %v754_v44 = vmul.f32 %v752_v41, %v749_v40 }
 0xd0e   :  { %v1599_v45 = vadd.f32 %v755_v42, %v754_v44  ;;  %v118_v42 = vpop.f32.mrf.mxu0 }
 0xd0f   :  { %v119_v44 = vadd.f32 %v1335_v10, %v118_v42 }
 0xd10   :  { %758 = vrot.lane.b32.xlu1 %v1599_v45, %s1238_s20 }
 0xd54   :  { %v784_v46 = vpop.permute.xlu0 %783 }
 0xd55   :  { %1150 = vmatmul.msk.f32.vlgmr.msrb.gmra.mxu3 %vm122_vm1, %v784_v46 }
 0xd56   :  { %1035 = vmatpush.msrb.mxu3 %v1343_v23 }
 0xd58   :  { %1036 = vmatpush.msrb.mxu3 %v1348_v24 }
 0xd5a   :  { %1037 = vmatpush.msrb.mxu3 %v1364_v27 }
 0xd5c   :  { %1038 = vmatpush.msrb.mxu3 %v1376_v29 }
 0xd82   :  { %v759_v48 = vpop.permute.xlu1 %758 }
 0xd83   :  { %1149 = vmatmul.msk.f32.vlgmr.msrb.gmra.mxu2 %vm122_vm1, %v759_v48  ;;  %1151 = vmatmul.msk.f32.vlgmr.msra.gmra.mxu1 %vm122_vm1, %v759_v48 }
 0xd84   :  { %1010 = vmatpush.msrb.mxu2 %v1354_v25 }
 0xd86   :  { %1011 = vmatpush.msrb.mxu2 %v1359_v26 }
 0xd88   :  { %1012 = vmatpush.msrb.mxu2 %v1371_v28 }
 0xd8a   :  { %1013 = vmatpush.msrb.mxu2 %v1383_v30 }
 0xdd8   :  { %v804_v23 = vpop.f32.mrf.mxu3 }
 0xdd9   :  { %v805_v24 = vadd.f32 %v1411_v37, %v804_v23 }
 0xddb   :  { %813 = vrot.lane.b32.xlu2 %v805_v24, %s1237_s17 }
 0xe00   :  { %v848_v27 = vpop.f32.mrf.mxu1 }
 0xe01   :  { %v849_v29 = vadd.f32 %v1328_v7, %v848_v27 }
 0xe03   :  { %857 = vrot.lane.b32.xlu0 %v849_v29, %s1237_s17  ;;  %v851_v56 = vadd.f32 %v849_v29, %v116_v55 }
 0xe05   :  { %v852_v57 = vmul.f32 0.5, %v851_v56 }
 0xe06   :  { %v779_v49 = vpop.f32.mrf.mxu2 }
 0xe07   :  { %v780_v50 = vadd.f32 %v1430_v43, %v779_v49 }
 0xe09   :  { %v807_v25 = vadd.f32 %v805_v24, %v780_v50 }
 0xe0b   :  { %v808_v51 = vmul.f32 0.5, %v807_v25 }
 0xe0d   :  { %1212 = vtanh.f32 %v808_v51 }
 0xe0e   :  { %1214 = vtanh.f32 %v852_v57 }
 0xe13   :  { %v1213_v26 = vpop.eup %1212 }
 0xe14   :  { %v810_v28 = vadd.f32 1.0, %v1213_v26  ;;  %v1215_v58 = vpop.eup %1214 }
 0xe15   :  { %v854_v59 = vadd.f32 1.0, %v1215_v58 }
 0xe16   :  { %v811_v52 = vmul.f32 0.5, %v810_v28 }
 0xe17   :  { %v855_v60 = vmul.f32 0.5, %v854_v59 }
 0xe18   :  { %v823_v6 = vsub.f32 1.0, %v811_v52  ;;  %v829_v5 = vmul.f32 %v811_v52, %v1594_v39 }
 0xe19   :  { %v867_v12 = vsub.f32 1.0, %v855_v60  ;;  %v873_v14 = vmul.f32 %v855_v60, %v1599_v45 }
 0xe35   :  { %v814_v30 = vpop.permute.xlu2 %813 }
 0xe36   :  { %v816_v53 = vmul.f32 %v814_v30, %v811_v52 }
 0xe38   :  { %818 = vrot.lane.b32.xlu1 %v816_v53, %s1237_s17 }
 0xe75   :  { %v858_v61 = vpop.permute.xlu0 %857 }
 0xe76   :  { %v860_v62 = vmul.f32 %v858_v61, %v855_v60 }
 0xe78   :  { %862 = vrot.lane.b32.xlu2 %v860_v62, %s1237_s17 }
 0xeaa   :  { %v819_v0 = vpop.permute.xlu1 %818 }
 0xeab   :  { %v821_v63 = vadd.f32 %v819_v0, %v780_v50 }
 0xead   :  { %1216 = vtanh.f32 %v821_v63 }
 0xeb3   :  { %v1217_v1 = vpop.eup %1216 }
 0xeb4   :  { %825 = vrot.lane.b32.xlu0 %v1217_v1, %s1238_s20 }
 0xed2   :  { %v863_v2 = vpop.permute.xlu2 %862 }
 0xed3   :  { %v865_v3 = vadd.f32 %v863_v2, %v116_v55 }
 0xed5   :  { %1218 = vtanh.f32 %v865_v3 }
 0xedb   :  { %v1219_v4 = vpop.eup %1218 }
 0xedc   :  { %869 = vrot.lane.b32.xlu1 %v1219_v4, %s1238_s20 }
 0xf26   :  { %v826_v8 = vpop.permute.xlu0 %825 }
 0xf27   :  { %v828_v9 = vmul.f32 %v826_v8, %v823_v6 }
 0xf29   :  { %v830_v11 = vadd.f32 %v829_v5, %v828_v9 }
 0xf2b   :  { %901 = vrot.lane.b32.xlu2 %v830_v11, %s1238_s20 }
 0xf4e   :  { %v870_v13 = vpop.permute.xlu1 %869 }
 0xf4f   :  { %v872_v15 = vmul.f32 %v870_v13, %v867_v12 }
 0xf51   :  { %v874_v16 = vadd.f32 %v873_v14, %v872_v15 }
 0xf53   :  { %876 = vrot.lane.b32.xlu0 %v874_v16, %s1238_s20 }
 0xf85   :  { %v902_v17 = vpop.permute.xlu2 %901 }
 0xf86   :  { %1153 = vmatmul.msk.f32.vlgmr.msra.gmra.mxu3 %vm122_vm1, %v902_v17  ;;  %v1239_v17 = vmov 32.0  }
 0xfc5   :  { %v877_v19 = vpop.permute.xlu0 %876 }
 0xfc6   :  { %1152 = vmatmul.msk.f32.vlgmr.msra.gmra.mxu2 %vm122_vm1, %v877_v19  ;;  %1154 = vmatmul.msk.f32.vlgmr.msrb.gmra.mxu1 %vm122_vm1, %v877_v19 }
0x1009   :  { %v922_v20 = vpop.f32.mrf.mxu3 }
0x100a   :  { %v923_v21 = vadd.f32 %v1411_v37, %v922_v20 }
0x100c   :  { %931 = vrot.lane.b32.xlu1 %v923_v21, %s1237_s17 }
0x1043   :  { %v966_v22 = vpop.f32.mrf.mxu1 }
0x1044   :  { %v967_v31 = vadd.f32 %v1328_v7, %v966_v22 }
0x1046   :  { %975 = vrot.lane.b32.xlu2 %v967_v31, %s1237_s17  ;;  %v969_v45 = vadd.f32 %v967_v31, %v119_v44 }
0x1048   :  { %v970_v7 = vmul.f32 0.5, %v969_v45 }
0x1049   :  { %v897_v32 = vpop.f32.mrf.mxu2 }
0x104a   :  { %v898_v33 = vadd.f32 %v1430_v43, %v897_v32 }
0x104c   :  { %v925_v34 = vadd.f32 %v923_v21, %v898_v33 }
0x104e   :  { %v926_v35 = vmul.f32 0.5, %v925_v34 }
0x1050   :  { %1220 = vtanh.f32 %v926_v35 }
0x1051   :  { %1222 = vtanh.f32 %v970_v7 }
0x1056   :  { %v1221_v36 = vpop.eup %1220 }
0x1057   :  { %v928_v38 = vadd.f32 1.0, %v1221_v36  ;;  %v1223_v46 = vpop.eup %1222  ;;  %v1166_v36 = vld [vmem:[%s1680_s7] ss:$0 sm:$0xff] }
0x1058   :  { %v972_v47 = vadd.f32 1.0, %v1223_v46 }
0x1059   :  { %v929_v39 = vmul.f32 0.5, %v928_v38  ;;  %v1167_v38 = vld [vmem:[%s1680_s7 + $0x1] ss:$0 sm:$0xff] }
0x105a   :  { %v973_v48 = vmul.f32 0.5, %v972_v47 }
0x105b   :  { %v941_v51 = vsub.f32 1.0, %v929_v39  ;;  %v947_v28 = vmul.f32 %v929_v39, %v830_v11 }
0x105c   :  { %v985_v53 = vsub.f32 1.0, %v973_v48  ;;  %v991_v55 = vmul.f32 %v973_v48, %v874_v16 }
0x107e   :  { %v932_v40 = vpop.permute.xlu1 %931 }
0x107f   :  { %v934_v41 = vmul.f32 %v932_v40, %v929_v39 }
0x1081   :  { %936 = vrot.lane.b32.xlu0 %v934_v41, %s1237_s17 }
0x10a0   :  { %v976_v23 = vpop.permute.xlu2 %975 }
0x10a1   :  { %v978_v24 = vmul.f32 %v976_v23, %v973_v48 }
0x10a3   :  { %980 = vrot.lane.b32.xlu1 %v978_v24, %s1237_s17 }
0x10f3   :  { %v937_v27 = vpop.permute.xlu0 %936 }
0x10f4   :  { %v939_v29 = vadd.f32 %v937_v27, %v898_v33 }
0x10f6   :  { %1224 = vtanh.f32 %v939_v29 }
0x10fc   :  { %v1225_v49 = vpop.eup %1224 }
0x10fd   :  { %943 = vrot.lane.b32.xlu2 %v1225_v49, %s1238_s20 }
0x1115   :  { %v981_v50 = vpop.permute.xlu1 %980 }
0x1116   :  { %v983_v25 = vadd.f32 %v981_v50, %v119_v44 }
0x1118   :  { %1226 = vtanh.f32 %v983_v25 }
0x111e   :  { %v1227_v10 = vpop.eup %1226 }
0x111f   :  { %987 = vrot.lane.b32.xlu0 %v1227_v10, %s1238_s20 }
0x1157   :  { %v944_v26 = vpop.permute.xlu2 %943 }
0x1158   :  { %v946_v52 = vmul.f32 %v944_v26, %v941_v51 }
0x115a   :  { %v948_v30 = vadd.f32 %v947_v28, %v946_v52 }
0x115c   :  { %1019 = vrot.lane.b32.xlu1 %v948_v30, %s1238_s20 }
0x1191   :  { %v988_v54 = vpop.permute.xlu0 %987 }
0x1192   :  { %v990_v56 = vmul.f32 %v988_v54, %v985_v53 }
0x1194   :  { %v992_v57 = vadd.f32 %v991_v55, %v990_v56 }
0x1196   :  { %994 = vrot.lane.b32.xlu2 %v992_v57, %s1238_s20 }
0x11ce   :  { %v1020_v58 = vpop.permute.xlu1 %1019 }
0x11cf   :  { %1156 = vmatmul.msk.f32.vlgmr.msrb.gmra.mxu3 %vm122_vm1, %v1020_v58 }
0x11f0   :  { %v995_v59 = vpop.permute.xlu2 %994 }
0x11f1   :  { %1155 = vmatmul.msk.f32.vlgmr.msrb.gmra.mxu2 %vm122_vm1, %v995_v59 }
0x1252   :  { %v1040_v60 = vpop.f32.mrf.mxu3 }
0x1253   :  { %v1041_v61 = vadd.f32 %v1411_v37, %v1040_v60 }
0x1255   :  { %1049 = vrot.lane.b32.xlu0 %v1041_v61, %s1237_s17 }
0x1274   :  { %v1015_v62 = vpop.f32.mrf.mxu2 }
0x1275   :  { %v1016_v0 = vadd.f32 %v1430_v43, %v1015_v62 }
0x1277   :  { %v1043_v63 = vadd.f32 %v1041_v61, %v1016_v0 }
0x1279   :  { %v1044_v1 = vmul.f32 0.5, %v1043_v63 }
0x127b   :  { %1228 = vtanh.f32 %v1044_v1 }
0x1281   :  { %v1229_v2 = vpop.eup %1228 }
0x1282   :  { %v1046_v3 = vadd.f32 1.0, %v1229_v2 }
0x1284   :  { %v1047_v4 = vmul.f32 0.5, %v1046_v3 }
0x1286   :  { %v1059_v37 = vsub.f32 1.0, %v1047_v4  ;;  %v1065_v13 = vmul.f32 %v1047_v4, %v948_v30 }
0x12c7   :  { %v1050_v6 = vpop.permute.xlu0 %1049 }
0x12c8   :  { %v1052_v8 = vmul.f32 %v1050_v6, %v1047_v4 }
0x12ca   :  { %1054 = vrot.lane.b32.xlu1 %v1052_v8, %s1237_s17 }
0x133c   :  { %v1055_v5 = vpop.permute.xlu1 %1054 }
0x133d   :  { %v1057_v9 = vadd.f32 %v1055_v5, %v1016_v0 }
0x133f   :  { %1230 = vtanh.f32 %v1057_v9 }
0x1340   :  { %1232 = vrcp.f32 %v1239_v17 }
0x1345   :  { %v1231_v11 = vpop.eup %1230 }
0x1346   :  { %1061 = vrot.lane.b32.xlu2 %v1231_v11, %s1238_s20  ;;  %v1233_v18 = vpop.eup %1232 }
0x1347   :  { %v1075_v19 = vmul.f32 32.0, %v1233_v18  ;;  %vm1079_vm2 = vweird.f32 %v1233_v18 }
0x1349   :  { %v1076_v20 = vsub.f32 1.0, %v1075_v19 }
0x134b   :  { %v1077_v21 = vmul.f32 %v1233_v18, %v1076_v20 }
0x134d   :  { %v1078_v22 = vadd.f32 %v1233_v18, %v1077_v21 }
0x134f   :  { %v1080_v31 = vsel %vm1079_vm2, %v1233_v18, %v1078_v22 }
0x13a0   :  { %v1062_v12 = vpop.permute.xlu2 %1061 }
0x13a1   :  { %v1064_v43 = vmul.f32 %v1062_v12, %v1059_v37 }
0x13a3   :  { %v1066_v14 = vadd.f32 %v1065_v13, %v1064_v43 }
0x13a5   :  { %1068 = vrot.lane.b32.xlu0 %v1066_v14, %s1238_s20 }
0x1417   :  { %v1069_v15 = vpop.permute.xlu0 %1068 }
0x1418   :  { %v1071_v16 = vsel %vm122_vm1, %v1069_v15, 0.0 }
0x1419   :  { %1072 = vadd.xlane.f32.xlu1 %v1071_v16 }
0x148c   :  { %v1073_v32 = vpop.xlane.xlu1 %1072 }
0x148d   :  { %v1081_v33 = vmul.f32 %v1080_v31, %v1073_v32 }
0x148f   :  { %v1082_v34 = vsub.f32 %v1066_v14, %v1081_v33 }
0x1491   :  { %v1083_v35 = vmul.f32 %v1082_v34, %v1082_v34 }
0x1493   :  { %1085 = vrot.lane.b32.xlu2 %v1083_v35, %s1238_s20 }
0x149b   :  { %1107 = vrot.lane.b32.xlu2 %v1166_v36, %s1240_s28 }
0x14a3   :  { %1114 = vrot.lane.b32.xlu2 %v1167_v38, %s1240_s28 }
0x14ed   :  { %v1086_v39 = vpop.permute.xlu2 %1085 }
0x14ee   :  { %v1088_v40 = vsel %vm122_vm1, %v1086_v39, 0.0 }
0x14ef   :  { %1089 = vadd.xlane.f32.xlu0 %v1088_v40 }
0x14f5   :  { %v1108_v47 = vpop.permute.xlu2 %1107 }
0x14fd   :  { %v1115_v49 = vpop.permute.xlu2 %1114 }
0x1562   :  { %v1090_v41 = vpop.xlane.xlu0 %1089 }
0x1563   :  { %v1091_v42 = vmul.f32 %v1090_v41, %v1080_v31 }
0x1565   :  { %v1092_v44 = vadd.f32 1e-05, %v1091_v42 }
0x1567   :  { %1234 = vrsqrt.f32 %v1092_v44  ;;  %vm1099_vm4 = vweird.f32 %v1092_v44 }
0x156d   :  { %v1235_v45 = vpop.eup %1234 }
0x156e   :  { %v1094_v7 = vmul.f32 %v1235_v45, %v1092_v44  ;;  %vm1100_vm3 = vweird.f32 %v1235_v45 }
0x156f   :  { %vm1101_vm5 = vmor %vm1099_vm4, %vm1100_vm3 }
0x1570   :  { %v1095_v46 = vmul.f32 %v1235_v45, %v1094_v7 }
0x1572   :  { %v1096_v48 = vmul.f32 0.5, %v1095_v46 }
0x1574   :  { %v1097_v23 = vsub.f32 1.5, %v1096_v48 }
0x1576   :  { %v1098_v24 = vmul.f32 %v1235_v45, %v1097_v23 }
0x1578   :  { %v1102_v27 = vsel %vm1101_vm5, %v1235_v45, %v1098_v24 }
0x1579   :  { %v1103_v29 = vmul.f32 %v1102_v27, %v1082_v34 }
0x157b   :  { %v1110_v50 = vmul.f32 %v1108_v47, %v1103_v29 }
0x157d   :  { %v1117_v25 = vadd.f32 %v1115_v49, %v1110_v50 }
0x157f   :  { %1119 = vrot.lane.b32.xlu2 %v1117_v25, %s1238_s20 }
0x15d9   :  { %v1120_v10 = vpop.permute.xlu2 %1119 }
0x15da   :  { %1122 = vst.msk [vmem:[%s1681_s8] sm:$0xff] %vm122_vm1, %v1120_v10 }

</bundles_post_ra>
